<compile_context>
chip_gen: v6e
topology: v6e:2x2x1
jax: 0.10.0
libtpu: 0.0.40
codegen_flags: <defaults>
</compile_context>

<pallas_src>
import jax
import jax.numpy as jnp
from jax import lax
from jax.experimental import pallas as pl
from jax.experimental.pallas import tpu as pltpu

NUM_GROUPS = 32
EPS = 1e-6


# ----------------------------------------------------------------------------
# Kernels
# ----------------------------------------------------------------------------
def _attn_single_pass_kernel(q_ref, k_ref, v_ref, x_ref, wp_ref, bp_ref, o_ref):
    """One (batch, q-tile) step when the whole key axis fits in one block.

    q_ref:(C,TQ) bf16 pre-scaled by C^-0.5; k_ref/v_ref:(C,HW) bf16;
    x_ref:(C,TQ) residual; wp_ref:(C,C) bf16; bp_ref:(C,1) f32 (contains
    the folded Wp@bv term).  No online-softmax machinery needed.
    """
    # (HW, TQ) = K^T Q, contracting the channel dim (no explicit transpose).
    s_t = lax.dot_general(k_ref[...], q_ref[...], (((0,), (0,)), ((), ())),
                          preferred_element_type=jnp.float32)
    m = jnp.max(s_t, axis=0, keepdims=True)                       # (1, TQ)
    p_t = jnp.exp(s_t - m)                                        # (HW, TQ)
    l = jnp.sum(p_t, axis=0, keepdims=True)                       # (1, TQ)
    attn = jnp.dot(v_ref[...], p_t.astype(jnp.bfloat16),
                   preferred_element_type=jnp.float32)            # (C, TQ)
    attn = attn * pl.reciprocal(l, approx=True)
    h = jnp.dot(wp_ref[...], attn.astype(jnp.bfloat16),
                preferred_element_type=jnp.float32) + bp_ref[...]
    o_ref[...] = (x_ref[...].astype(jnp.float32) + h).astype(o_ref.dtype)


def _attn_flash_kernel(q_ref, k_ref, v_ref, x_ref, wp_ref, bp_ref, o_ref,
                       m_scr, l_scr, acc_scr):
    """One (batch, q-tile, k-block) step with an online (flash) softmax."""
    kb = pl.program_id(2)
    nk = pl.num_programs(2)

    @pl.when(kb == 0)
    def _init():
        m_scr[...] = jnp.full(m_scr.shape, -jnp.inf, jnp.float32)
        l_scr[...] = jnp.zeros(l_scr.shape, jnp.float32)
        acc_scr[...] = jnp.zeros(acc_scr.shape, jnp.float32)

    # (TK, TQ) = K^T Q over channels; K/V arrive pre-projected in bf16.
    s_t = lax.dot_general(k_ref[...], q_ref[...], (((0,), (0,)), ((), ())),
                          preferred_element_type=jnp.float32)

    m_prev = m_scr[...]
    m_new = jnp.maximum(m_prev, jnp.max(s_t, axis=0, keepdims=True))  # (1, TQ)
    alpha = jnp.exp(m_prev - m_new)
    p_t = jnp.exp(s_t - m_new)                                        # (TK, TQ)
    l_scr[...] = alpha * l_scr[...] + jnp.sum(p_t, axis=0, keepdims=True)
    acc_scr[...] = alpha * acc_scr[...] + jnp.dot(
        v_ref[...], p_t.astype(jnp.bfloat16), preferred_element_type=jnp.float32)
    m_scr[...] = m_new

    @pl.when(kb == nk - 1)
    def _finalize():
        attn = acc_scr[...] * pl.reciprocal(l_scr[...], approx=True)   # (C, TQ)
        h = jnp.dot(wp_ref[...], attn.astype(jnp.bfloat16),
                    preferred_element_type=jnp.float32) + bp_ref[...]
        o_ref[...] = (x_ref[...].astype(jnp.float32) + h).astype(o_ref.dtype)


# ----------------------------------------------------------------------------
# Wrapper
# ----------------------------------------------------------------------------
def _pick_tile(n, target):
    """Largest multiple of 128 that divides n and is <= target (else n)."""
    if n <= target:
        return n
    t = (target // 128) * 128
    while t >= 128:
        if n % t == 0:
            return t
        t -= 128
    # Ragged HW that no 128-multiple divides: fall back to one full-extent
    # block (correct; avoids a ragged <128-lane trailing tile).
    return n


def attn_block(x_nchw, params, *, tq=512, tk=512, single_pass=None):
    """Forward pass of AttnBlock.  x_nchw: (B, C, H, W) (PyTorch NCHW)."""
    B, C, H, W = x_nchw.shape
    HW = H * W
    assert C % NUM_GROUPS == 0, "GroupNorm(32) requires C % 32 == 0"
    cpg = C // NUM_GROUPS
    out_dtype = x_nchw.dtype

    x = x_nchw.reshape(B, C, HW)           # channels-first, flat spatial
    xf = x.astype(jnp.float32)

    # ---- GroupNorm stats pre-pass (tiny, mem-bound, two-pass variance) ----
    xg = xf.reshape(B, NUM_GROUPS, cpg * HW)
    mean_g = jnp.mean(xg, axis=-1)                                  # (B, G)
    var_g = jnp.mean(jnp.square(xg - mean_g[..., None]), axis=-1)   # biased
    rstd_g = lax.rsqrt(var_g + EPS)
    mean_c = jnp.repeat(mean_g, cpg, axis=1)                        # (B, C)
    rstd_c = jnp.repeat(rstd_g, cpg, axis=1)

    gamma = params["gamma"].reshape(1, C).astype(jnp.float32)
    beta = params["beta"].reshape(1, C).astype(jnp.float32)
    scale = (gamma * rstd_c)[..., None]                             # (B, C, 1)
    shift = (beta - mean_c * gamma * rstd_c)[..., None]
    h_norm = (xf * scale + shift).astype(jnp.bfloat16)              # (B, C, HW)

    # ---- Q/K/V projections hoisted out of the kernel (once per image) ----
    # Conv2d 1x1 weight (C_out, C_in, 1, 1) -> (C, C); channels-first means
    # the projection is W @ h directly (no transposes anywhere).
    wq = params["wq"].reshape(C, C).astype(jnp.bfloat16)
    wk = params["wk"].reshape(C, C).astype(jnp.bfloat16)
    wv = params["wv"].reshape(C, C).astype(jnp.bfloat16)
    wp = params["wp"].reshape(C, C).astype(jnp.bfloat16)
    bq = params["bq"].reshape(1, C, 1).astype(jnp.float32)

    proj = lambda w: jnp.einsum("oc,bcn->bon", w, h_norm,
                                preferred_element_type=jnp.float32)
    q_scale = jnp.float32(float(C) ** -0.5)
    q = ((proj(wq) + bq) * q_scale).astype(jnp.bfloat16)            # (B, C, HW)
    k = proj(wk).astype(jnp.bfloat16)   # bk dropped: softmax shift-invariant
    v = proj(wv).astype(jnp.bfloat16)   # bv deferred into bp below (exact)
    bp_folded = (params["wp"].reshape(C, C).astype(jnp.float32)
                 @ params["bv"].reshape(C).astype(jnp.float32)
                 + params["bp"].reshape(C).astype(jnp.float32)).reshape(C, 1)

    # ---- tiling ----
    TQ = _pick_tile(HW, tq)
    # Keep >= 2 parallel programs so both v7x TensorCores get work.
    while (B * (HW // TQ) < 2 and TQ > 128 and TQ % 2 == 0
           and HW % (TQ // 2) == 0):
        TQ //= 2
    if single_pass is None:
        single_pass = HW <= max(tk, 1024)   # whole key axis fits one block
    TK = HW if single_pass else _pick_tile(HW, tk)

    vmem_limit = 32 * 1024 * 1024

    if TK == HW:
        # ---------------- single-pass softmax path ----------------
        grid = (B, HW // TQ)
        q_spec = pl.BlockSpec((pl.Squeezed(), C, TQ), lambda b, i: (b, 0, i))
        kv_spec = pl.BlockSpec((pl.Squeezed(), C, HW), lambda b, i: (b, 0, 0))
        out_spec = pl.BlockSpec((pl.Squeezed(), C, TQ), lambda b, i: (b, 0, i))
        w_spec = pl.BlockSpec((C, C), lambda b, i: (0, 0),
                              pipeline_mode=pl.Buffered(1))
        b_spec = pl.BlockSpec((C, 1), lambda b, i: (0, 0),
                              pipeline_mode=pl.Buffered(1))
        out = pl.pallas_call(
            _attn_single_pass_kernel,
            out_shape=jax.ShapeDtypeStruct((B, C, HW), out_dtype),
            grid_spec=pltpu.PrefetchScalarGridSpec(
                num_scalar_prefetch=0,
                grid=grid,
                in_specs=[q_spec, kv_spec, kv_spec, q_spec, w_spec, b_spec],
                out_specs=out_spec,
                scratch_shapes=[],
            ),
            compiler_params=pltpu.CompilerParams(
                dimension_semantics=("parallel", "parallel"),
                vmem_limit_bytes=vmem_limit,
            ),
        )(q, k, v, x, wp, bp_folded)
    else:
        # ---------------- flash (online-softmax) path ----------------
        grid = (B, HW // TQ, HW // TK)
        q_spec = pl.BlockSpec((pl.Squeezed(), C, TQ), lambda b, i, kb: (b, 0, i))
        kv_spec = pl.BlockSpec((pl.Squeezed(), C, TK), lambda b, i, kb: (b, 0, kb))
        out_spec = pl.BlockSpec((pl.Squeezed(), C, TQ), lambda b, i, kb: (b, 0, i))
        w_spec = pl.BlockSpec((C, C), lambda b, i, kb: (0, 0),
                              pipeline_mode=pl.Buffered(1))
        b_spec = pl.BlockSpec((C, 1), lambda b, i, kb: (0, 0),
                              pipeline_mode=pl.Buffered(1))
        out = pl.pallas_call(
            _attn_flash_kernel,
            out_shape=jax.ShapeDtypeStruct((B, C, HW), out_dtype),
            grid_spec=pltpu.PrefetchScalarGridSpec(
                num_scalar_prefetch=0,
                grid=grid,
                in_specs=[q_spec, kv_spec, kv_spec, q_spec, w_spec, b_spec],
                out_specs=out_spec,
                scratch_shapes=[
                    pltpu.VMEM((1, TQ), jnp.float32),    # running max  m
                    pltpu.VMEM((1, TQ), jnp.float32),    # running sum  l
                    pltpu.VMEM((C, TQ), jnp.float32),    # output accumulator
                ],
            ),
            compiler_params=pltpu.CompilerParams(
                dimension_semantics=("parallel", "parallel", "arbitrary"),
                vmem_limit_bytes=vmem_limit,
            ),
        )(q, k, v, x, wp, bp_folded)

    return out.reshape(B, C, H, W)


# ----------------------------------------------------------------------------
# Pure-JAX reference (mirrors the PyTorch forward exactly, f32)
# ----------------------------------------------------------------------------
def attn_block_ref(x, p):
    B, C, H, W = x.shape
    G = NUM_GROUPS
    xg = x.reshape(B, G, C // G, H, W)
    mean = xg.mean(axis=(2, 3, 4), keepdims=True)
    var = xg.var(axis=(2, 3, 4), keepdims=True)
    hn = ((xg - mean) / jnp.sqrt(var + EPS)).reshape(B, C, H, W)
    hn = hn * p["gamma"].reshape(1, C, 1, 1) + p["beta"].reshape(1, C, 1, 1)

    def conv1x1(h, w, b):
        return jnp.einsum("bchw,oc->bohw", h, w.reshape(C, C)) + b.reshape(1, C, 1, 1)

    q = conv1x1(hn, p["wq"], p["bq"])
    k = conv1x1(hn, p["wk"], p["bk"])
    v = conv1x1(hn, p["wv"], p["bv"])
    q = jnp.transpose(q.reshape(B, C, H * W), (0, 2, 1))            # (B, HW, C)
    k = k.reshape(B, C, H * W)
    w_ = jnp.einsum("bqc,bck->bqk", q, k) * (int(C) ** -0.5)
    w_ = jax.nn.softmax(w_, axis=2)
    v = v.reshape(B, C, H * W)
    h_ = jnp.einsum("bck,bqk->bcq", v, w_).reshape(B, C, H, W)
    h_ = conv1x1(h_, p["wp"], p["bp"])
    return x + h_


def make_params(key, C):
    ks = jax.random.split(key, 10)
    init = lambda k, shape, s=0.05: (s * jax.random.normal(k, shape)).astype(jnp.float32)
    return {
        "gamma": 1.0 + init(ks[0], (C,)),
        "beta": init(ks[1], (C,)),
        "wq": init(ks[2], (C, C, 1, 1)), "bq": init(ks[3], (C,)),
        "wk": init(ks[4], (C, C, 1, 1)), "bk": init(ks[5], (C,)),
        "wv": init(ks[6], (C, C, 1, 1)), "bv": init(ks[7], (C,)),
        "wp": init(ks[8], (C, C, 1, 1)), "bp": init(ks[9], (C,)),
    }


if __name__ == "__main__":
    # C must be a multiple of 32 (GroupNorm groups); 128 keeps lanes dense.
    B, C, H, W = 2, 128, 16, 16
    key = jax.random.PRNGKey(0)
    kx, kp = jax.random.split(key)
    x = jax.random.normal(kx, (B, C, H, W), dtype=jnp.float32)
    params = make_params(kp, C)

    ref = attn_block_ref(x, params)

    # Default path: HW = 256 fits one key block -> single-pass softmax kernel.
    out_single = jax.block_until_ready(attn_block(x, params))
    # Forced small tiles: exercises the online-softmax (flash) kernel with
    # grid = (B, 2, 2) even at this small size.
    out_flash = jax.block_until_ready(
        attn_block(x, params, tq=128, tk=128, single_pass=False))

    for name, out in (("single-pass", out_single), ("flash", out_flash)):
        assert out.shape == (B, C, H, W)
        o32 = out.astype(jnp.float32)
        max_err = float(jnp.max(jnp.abs(o32 - ref)))
        # bf16 MXU operands + approx reciprocal -> relaxed (but tight) tolerance.
        assert jnp.allclose(o32, ref, atol=2e-2, rtol=2e-2), \
            f"{name} path mismatch vs reference (max abs err {max_err})"

    print("KERNEL_OK")
</pallas_src>

<mosaic_0001>
module attributes {stable_mosaic.version = 11 : i64} {
  func.func @_attn_single_pass_kernel(%arg0: i32, %arg1: i32, %arg2: memref<1x128x256xbf16, #tpu.memory_space<vmem>>, %arg3: memref<1x128x256xbf16, #tpu.memory_space<vmem>>, %arg4: memref<1x128x256xbf16, #tpu.memory_space<vmem>>, %arg5: memref<1x128x256xf32, #tpu.memory_space<vmem>>, %arg6: memref<128x128xbf16, #tpu.memory_space<vmem>>, %arg7: memref<128x1xf32, #tpu.memory_space<vmem>>, %arg8: memref<1x128x256xf32, #tpu.memory_space<vmem>>) attributes {dimension_semantics = [#tpu.dimension_semantics<parallel>, #tpu.dimension_semantics<parallel>], iteration_bounds = array<i64: 2, 1>, scalar_prefetch = 0 : i64, scratch_operands = 0 : i64, tpu.core_type = #tpu.core_type<tc>, window_params = [{transform_indices = @transform_0, window_bounds = array<i64: 1, 128, 256>}, {transform_indices = @transform_1, window_bounds = array<i64: 1, 128, 256>}, {transform_indices = @transform_2, window_bounds = array<i64: 1, 128, 256>}, {transform_indices = @transform_3, window_bounds = array<i64: 1, 128, 256>}, {pipeline_mode = #tpu.pipeline_mode<synchronous>, transform_indices = @transform_4, window_bounds = array<i64: 128, 128>}, {pipeline_mode = #tpu.pipeline_mode<synchronous>, transform_indices = @transform_5, window_bounds = array<i64: 128, 1>}, {transform_indices = @transform_6, window_bounds = array<i64: 1, 128, 256>}]} {
    %c0 = arith.constant 0 : index
    %c0_0 = arith.constant 0 : index
    %c0_1 = arith.constant 0 : index
    %0 = vector.load %arg3[%c0, %c0_0, %c0_1] : memref<1x128x256xbf16, #tpu.memory_space<vmem>>, vector<1x128x256xbf16>
    %1 = vector.shape_cast %0 : vector<1x128x256xbf16> to vector<128x256xbf16>
    %c0_2 = arith.constant 0 : index
    %c0_3 = arith.constant 0 : index
    %c0_4 = arith.constant 0 : index
    %2 = vector.load %arg2[%c0_2, %c0_3, %c0_4] : memref<1x128x256xbf16, #tpu.memory_space<vmem>>, vector<1x128x256xbf16>
    %3 = vector.shape_cast %2 : vector<1x128x256xbf16> to vector<128x256xbf16>
    %cst = arith.constant dense<0.000000e+00> : vector<256x256xf32>
    %4 = tpu.matmul %1, %3, %cst {dimension_numbers = #tpu.dot_dimension_numbers<[0], [0], [1], [1], [0, 1, 1, 1], [], []>} : vector<128x256xbf16>, vector<128x256xbf16>, vector<256x256xf32> -> vector<256x256xf32>
    %cst_5 = arith.constant dense<0xFF800000> : vector<256xf32>
    %5 = vector.multi_reduction <maximumf>, %4, %cst_5 [0] : vector<256x256xf32> to vector<256xf32>
    %6 = vector.shape_cast %5 : vector<256xf32> to vector<1x256xf32>
    %7 = vector.broadcast %6 : vector<1x256xf32> to vector<256x256xf32>
    %8 = arith.subf %4, %7 : vector<256x256xf32>
    %9 = math.exp %8 : vector<256x256xf32>
    %cst_6 = arith.constant dense<0.000000e+00> : vector<256xf32>
    %10 = vector.multi_reduction <add>, %9, %cst_6 [0] : vector<256x256xf32> to vector<256xf32>
    %11 = vector.shape_cast %10 : vector<256xf32> to vector<1x256xf32>
    %c0_7 = arith.constant 0 : index
    %c0_8 = arith.constant 0 : index
    %c0_9 = arith.constant 0 : index
    %12 = vector.load %arg4[%c0_7, %c0_8, %c0_9] : memref<1x128x256xbf16, #tpu.memory_space<vmem>>, vector<1x128x256xbf16>
    %13 = vector.shape_cast %12 : vector<1x128x256xbf16> to vector<128x256xbf16>
    %14 = arith.truncf %9 : vector<256x256xf32> to vector<256x256xbf16>
    %cst_10 = arith.constant dense<0.000000e+00> : vector<128x256xf32>
    %15 = tpu.matmul %13, %14, %cst_10 {dimension_numbers = #tpu.dot_dimension_numbers<[1], [0], [0], [1], [0, 0, 1, 1], [], []>} : vector<128x256xbf16>, vector<256x256xbf16>, vector<128x256xf32> -> vector<128x256xf32>
    %16 = tpu.reciprocal %11 {approx = true} : vector<1x256xf32> -> vector<1x256xf32>
    %17 = vector.broadcast %16 : vector<1x256xf32> to vector<128x256xf32>
    %18 = arith.mulf %15, %17 : vector<128x256xf32>
    %c0_11 = arith.constant 0 : index
    %c0_12 = arith.constant 0 : index
    %19 = vector.load %arg6[%c0_11, %c0_12] : memref<128x128xbf16, #tpu.memory_space<vmem>>, vector<128x128xbf16>
    %20 = arith.truncf %18 : vector<128x256xf32> to vector<128x256xbf16>
    %cst_13 = arith.constant dense<0.000000e+00> : vector<128x256xf32>
    %21 = tpu.matmul %19, %20, %cst_13 {dimension_numbers = #tpu.dot_dimension_numbers<[1], [0], [0], [1], [0, 0, 1, 1], [], []>} : vector<128x128xbf16>, vector<128x256xbf16>, vector<128x256xf32> -> vector<128x256xf32>
    %c0_14 = arith.constant 0 : index
    %c0_15 = arith.constant 0 : index
    %22 = vector.load %arg7[%c0_14, %c0_15] : memref<128x1xf32, #tpu.memory_space<vmem>>, vector<128x1xf32>
    %23 = vector.broadcast %22 : vector<128x1xf32> to vector<128x256xf32>
    %24 = arith.addf %21, %23 : vector<128x256xf32>
    %c0_16 = arith.constant 0 : index
    %c0_17 = arith.constant 0 : index
    %c0_18 = arith.constant 0 : index
    %25 = vector.load %arg5[%c0_16, %c0_17, %c0_18] : memref<1x128x256xf32, #tpu.memory_space<vmem>>, vector<1x128x256xf32>
    %26 = vector.shape_cast %25 : vector<1x128x256xf32> to vector<128x256xf32>
    %27 = arith.addf %26, %24 : vector<128x256xf32>
    %c0_19 = arith.constant 0 : index
    %c0_20 = arith.constant 0 : index
    %c0_21 = arith.constant 0 : index
    %28 = vector.load %arg8[%c0_19, %c0_20, %c0_21] : memref<1x128x256xf32, #tpu.memory_space<vmem>>, vector<1x128x256xf32>
    %29 = vector.shape_cast %28 : vector<1x128x256xf32> to vector<128x256xf32>
    %30 = vector.shape_cast %27 : vector<128x256xf32> to vector<1x128x256xf32>
    tpu.vector_store %arg8[%c0_19, %c0_20, %c0_21], %30 {strides = array<i32>} : memref<1x128x256xf32, #tpu.memory_space<vmem>>, vector<1x128x256xf32>,
    return
  }
  func.func @transform_0(%arg0: i32, %arg1: i32) -> (i32, i32, i32) {
    %c0_i32 = arith.constant 0 : i32
    %c0_i32_0 = arith.constant 0 : i32
    return %arg0, %c0_i32, %arg1 : i32, i32, i32
  }
  func.func @transform_1(%arg0: i32, %arg1: i32) -> (i32, i32, i32) {
    %c0_i32 = arith.constant 0 : i32
    %c0_i32_0 = arith.constant 0 : i32
    %c0_i32_1 = arith.constant 0 : i32
    return %arg0, %c0_i32, %c0_i32_0 : i32, i32, i32
  }
  func.func @transform_2(%arg0: i32, %arg1: i32) -> (i32, i32, i32) {
    %c0_i32 = arith.constant 0 : i32
    %c0_i32_0 = arith.constant 0 : i32
    %c0_i32_1 = arith.constant 0 : i32
    return %arg0, %c0_i32, %c0_i32_0 : i32, i32, i32
  }
  func.func @transform_3(%arg0: i32, %arg1: i32) -> (i32, i32, i32) {
    %c0_i32 = arith.constant 0 : i32
    %c0_i32_0 = arith.constant 0 : i32
    return %arg0, %c0_i32, %arg1 : i32, i32, i32
  }
  func.func @transform_4(%arg0: i32, %arg1: i32) -> (i32, i32) {
    %c0_i32 = arith.constant 0 : i32
    %c0_i32_0 = arith.constant 0 : i32
    %c0_i32_1 = arith.constant 0 : i32
    return %c0_i32, %c0_i32_0 : i32, i32
  }
  func.func @transform_5(%arg0: i32, %arg1: i32) -> (i32, i32) {
    %c0_i32 = arith.constant 0 : i32
    %c0_i32_0 = arith.constant 0 : i32
    %c0_i32_1 = arith.constant 0 : i32
    return %c0_i32, %c0_i32_0 : i32, i32
  }
  func.func @transform_6(%arg0: i32, %arg1: i32) -> (i32, i32, i32) {
    %c0_i32 = arith.constant 0 : i32
    %c0_i32_0 = arith.constant 0 : i32
    return %arg0, %c0_i32, %arg1 : i32, i32, i32
  }
}

</mosaic_0001>

<bundles_post_ra>
// kernel: tpu_custom_call.1
= control target key start
LH: loop header
LB: loop body
LE: loop exit
PB: predicated region body
PF: predicated region fallthrough
CT: control target
= control target key end

     0   :  { %s3737_s0 = inlined_call_operand.hbm [shape: bf16[2,128,256], index: 0, kind: input, shape index: {}]   ;;  %s3738_s1 = inlined_call_operand.hbm [shape: bf16[2,128,256], index: 1, kind: input, shape index: {}]   ;;  %s3739_s2 = inlined_call_operand.hbm [shape: bf16[2,128,256], index: 2, kind: input, shape index: {}]   ;;  %s3740_s3 = inlined_call_operand.hbm [shape: f32[2,128,256], index: 3, kind: input, shape index: {}]   ;;  %s3741_s4 = inlined_call_operand.vmem [shape: bf16[128,128], index: 4, kind: input, shape index: {}]   ;;  %s3742_s5 = inlined_call_operand.vmem [shape: f32[128,1], index: 5, kind: input, shape index: {}]   ;;  %s3743_s6 = inlined_call_operand.hbm [shape: f32[2,128,256], index: 6, kind: output, shape index: {}]  }
   0x1   :  { %3778 = sst [smem:[#allocation36_spill]] %s3738_s1 }
   0x2   :  { %3779 = sst [smem:[#allocation37_spill]] %s3743_s6 }
   0x3   :  { %11 = vsyncpa [#allocation3], 0 }
   0x4   :  { %13 = vsyncpa [#allocation3 + $0x1], 0 }
   0x5   :  { %14 = vsyncpa [#allocation6], 0 }
   0x6   :  { %16 = vsyncpa [#allocation6 + $0x1], 0 }
   0x7   :  { %17 = vsyncpa [#allocation9], 0 }
   0x8   :  { %19 = vsyncpa [#allocation9 + $0x1], 0 }
   0x9   :  { %20 = vsyncpa [#allocation4], 0 }
   0xa   :  { %22 = vsyncpa [#allocation4 + $0x1], 0  ;;  %s2669_s21 = smov 0   ;;  %s2671_s22 = smov 0  }
   0xb   :  { %s2673_s23 = smov 0   ;;  %s2675_s24 = smov 0  }
   0xc   :  { %s2677_s25 = smov 0   ;;  %s2679_s26 = smov 0  }
   0xd LB: > { %3780 = sst [smem:[#allocation15_spill]] %s2600_s21  ;;  %s2700_s27 = sadd.s32 4294967295, %s2620_s26   ;;  %s2620_s26 = sphi %s2679_s26, %s28_s26   ;;  %s2616_s25 = sphi %s2677_s25, %s3852_s25   ;;  %s2612_s24 = sphi %s2675_s24, %s3851_s24   ;;  %s2608_s23 = sphi %s2673_s23, %s3847_s23   ;;  %s2604_s22 = sphi %s2671_s22, %s3850_s22   ;;  %s2600_s21 = sphi %s2669_s21, %s3849_s21  }
   0xe   : > { %3781 = sst [smem:[#allocation16_spill]] %s2608_s23  ;;  %s2003_s28 = sadd.s32 4294967294, %s2620_s26  }
   0xf   : > { %s40_s29 = sadd.s32 1, %s2616_s25  ;;  %s49_s30 = sadd.s32 1, %s2608_s23 }
  0x10   : > { %p42_p0 = scmp.ge.s32.totalorder %s40_s29, 2  ;;  %p56_p1 = scmp.ne.s32.totalorder %s2608_s23, %s2604_s22 }
  0x11   : > { %p57_p2 = scmp.eq.s32.totalorder %s2620_s26, 0  ;;  %p62_p3 = scmp.ne.s32.totalorder %s2604_s22, %s2600_s21 }
  0x12   : > { %s3854_s29 = smov (%p42_p0, %s40_s29), 0  ;;  %p63_p5 = scmp.eq.s32.totalorder %s2700_s27, 0 }
  0x13   : > { %3782 = sst [smem:[#allocation17_spill]] %s3854_s29  ;;  %p2712_p4 = por %p57_p2, %p56_p1 }
  0x14   : > { %s44_s8 = ssub.s32 %s2616_s25, %s3854_s29  ;;  %p210_p6 = scmp.eq.s32.totalorder %s2700_s27, 1 }
  0x15   : > { %p47_p7 = scmp.eq.s32.totalorder %s44_s8, 0  ;;  %p2720_p8 = por %p63_p5, %p62_p3 }
  0x16   : > { %p2724_p9 = por %p210_p6, %p56_p1  ;;  %p216_p10 = scmp.eq.s32.totalorder %s2003_s28, 1 }
  0x17   : > { %s2729_s11 = scalar_select %p47_p7, %s2608_s23, %s49_s30  }
  0x18   : > { %s3785_s10 = scalar_select %p2724_p9, 1, 0 }
  0x19   : > { %3787 = sst [smem:[#allocation19_spill]] %s2729_s11  ;;  %p2731_p11 = por %p216_p10, %p62_p3 }
  0x1a   : > { %3786 = sst [smem:[#allocation18_spill]] %s3785_s10  ;;  %p2149_p13 = scmp.lt.s32.totalorder %s2620_s26, 2 }
  0x1b   : > { %s3788_s12 = scalar_select %p2731_p11, 1, 0 }
  0x1c   : > { %s2738_s13 = sand.u32 1, %s2608_s23   ;;  %s2744_s15 = sshll.u32 %s2616_s25, 11 }
  0x1d   : > { %3789 = sst [smem:[#allocation20_spill]] %s3788_s12  ;;  %s2741_s14 = sshll.u32 %s2738_s13, 7 }
  0x1e   : > { %p2748_p0 = pnand %p2149_p13, %p2712_p4  ;;  %s265_s17 = sand.u32 1, %s2620_s26  }
  0x1f   : > { %s3791_s1 = sld [smem:[#allocation36_spill]]  ;;  %s269_s28 = scalar_lea.vmem [#allocation5], %s2741_s14 }
  0x20   : > { %s276_s30 = sshll.u32 %s269_s28, 4  ;;  %p2018_p1 = scmp.ge.s32.totalorder %s2620_s26, 1  ;;  %s277_s30 = int_to_ptr.vmem [resolvable:$true] %s276_s30 }
  0x21   : > { %p328_p2 = scmp.lt.s32.totalorder %s2620_s26, 3  ;;  %s2760_s8 = scalar_lea.sflag [#allocation6], %s265_s17 }
  0x22   : > { %p2422_p3 = pneg %p2748_p0  ;;  %s2433_s7 = scalar_lea.vmem %s277_s30, 2048 }
  0x23   : > { %p2434_p4 = scmp.ne.s32.totalorder %s277_s30, %s2433_s7  ;;  %s2622_s29 = smov [#allocation5]  }
  0x24   : > { %s2438_s11 = sshll.u32 %s2622_s29, 4  ;;  %s2439_s11 = int_to_ptr.vmem [resolvable:$false] %s2438_s11 }
  0x25   : > { %s275_s20 = scalar_lea.hbm %s3791_s1, %s2744_s15  ;;  %p2436_p5 = pnand %p2434_p4, %p2422_p3 }
  0x26   : > { %s2440_s18 = scalar_lea.vmem %s2439_s11, 4096  ;;  %p2441_p7 = scmp.lt.s32.totalorder %s277_s30, %s2439_s11 }
  0x27   : > { %p2437_p6 = pneg %p2436_p5  ;;  %p2442_p10 = scmp.lt.s32.totalorder %s2440_s18, %s2433_s7 }
  0x29   : > { %p2443_p13 = por %p2442_p10, %p2441_p7 }
  0x2b   : > { %p2444_p12 = pnand %p2443_p13, %p2437_p6 }
  0x2d   : > { %2447 = shalt.err (!%p2444_p12)
}
  0x2e   : > { %s3751_s19 = smov 128   ;;  %s2624_s17 = smov 8  }
  0x2f   : > { %2138 = dma.hbm_to_vmem [thread:$0]  (!%p2748_p0), %s275_s20, 2048, %s277_s30, %s2760_s8, %s3751_s19, %s3751_s19, %s2624_s17  }
  0x30   : > { %p2777_p4 = pnand %p2018_p1, %p328_p2  ;;  %s254_s7 = scalar_lea.hbm %s3737_s0, %s2744_s15 }
  0x31   : > { %s246_s18 = scalar_lea.vmem [#allocation2], %s2741_s14  ;;  %s296_s21 = scalar_lea.hbm %s3739_s2, %s2744_s15 }
  0x32   : > { %s255_s1 = sshll.u32 %s246_s18, 4  ;;  %s243_s6 = scalar_lea.sflag [#allocation3], %s2738_s13  ;;  %s256_s1 = int_to_ptr.vmem [resolvable:$true] %s255_s1 }
  0x33   : > { %s2461_s10 = scalar_lea.vmem %s256_s1, 2048  ;;  %s2625_s20 = smov [#allocation2]  }
  0x34   : > { %p2462_p12 = scmp.ne.s32.totalorder %s256_s1, %s2461_s10  ;;  %s2466_s30 = sshll.u32 %s2625_s20, 4  ;;  %s2467_s30 = int_to_ptr.vmem [resolvable:$false] %s2466_s30 }
  0x35   : > { %s2468_s19 = scalar_lea.vmem %s2467_s30, 4096  ;;  %p2469_p5 = scmp.lt.s32.totalorder %s256_s1, %s2467_s30 }
  0x36   : > { %p2464_p1 = pnand %p2462_p12, %p2422_p3  ;;  %p2470_p6 = scmp.lt.s32.totalorder %s2468_s19, %s2461_s10 }
  0x38   : > { %p2465_p2 = pneg %p2464_p1  ;;  %p2471_p7 = por %p2470_p6, %p2469_p5 }
  0x3a   : > { %p2472_p10 = pnand %p2471_p7, %p2465_p2 }
  0x3c   : > { %2475 = shalt.err (!%p2472_p10)
}
  0x3d   : > { %s3793_s23 = smov 128   ;;  %s290_s12 = scalar_lea.vmem [#allocation7], %s2741_s14 }
  0x3e   : > { %2135 = dma.hbm_to_vmem [thread:$0]  (!%p2748_p0), %s254_s7, 2048, %s256_s1, %s243_s6, %s3793_s23, %s3793_s23, %s2624_s17  }
  0x3f   : > { %s297_s11 = sshll.u32 %s290_s12, 4  ;;  %s2015_s28 = sshll.u32 %s2738_s13, 8  ;;  %s298_s11 = int_to_ptr.vmem [resolvable:$true] %s297_s11 }
  0x40   : > { %s2489_s18 = scalar_lea.vmem %s298_s11, 2048  ;;  %s2626_s10 = smov [#allocation7]  }
  0x41   : > { %p2490_p13 = scmp.ne.s32.totalorder %s298_s11, %s2489_s18  ;;  %s2494_s19 = sshll.u32 %s2626_s10, 4  ;;  %s2495_s19 = int_to_ptr.vmem [resolvable:$false] %s2494_s19 }
  0x42   : > { %s2496_s20 = scalar_lea.vmem %s2495_s19, 4096  ;;  %p2497_p2 = scmp.lt.s32.totalorder %s298_s11, %s2495_s19 }
  0x43   : > { %p2492_p12 = pnand %p2490_p13, %p2422_p3  ;;  %p2498_p5 = scmp.lt.s32.totalorder %s2496_s20, %s2489_s18 }
  0x45   : > { %p2493_p1 = pneg %p2492_p12  ;;  %p2499_p6 = por %p2498_p5, %p2497_p2 }
  0x47   : > { %p2500_p7 = pnand %p2499_p6, %p2493_p1 }
  0x49   : > { %2503 = shalt.err (!%p2500_p7)
}
  0x4a   : > { %2141 = dma.hbm_to_vmem [thread:$0]  (!%p2748_p0), %s296_s21, 2048, %s298_s11, %s2760_s8, %s3793_s23, %s3793_s23, %s2624_s17  }
  0x4b   : > { %s2088_s14 = sshll.u32 %s2616_s25, 12  ;;  %s311_s18 = scalar_lea.vmem [#allocation8], %s2015_s28 }
  0x4c   : > { %s319_s12 = scalar_lea.hbm %s3740_s3, %s2088_s14  ;;  %s320_s10 = sshll.u32 %s311_s18, 4  ;;  %s321_s10 = int_to_ptr.vmem [resolvable:$true] %s320_s10 }
  0x4d   : > { %s308_s19 = scalar_lea.sflag [#allocation9], %s2738_s13  ;;  %s2517_s20 = scalar_lea.vmem %s321_s10, 4096 }
  0x4e   : > { %p2518_p10 = scmp.ne.s32.totalorder %s321_s10, %s2517_s20  ;;  %s2627_s15 = smov [#allocation8]  }
  0x4f   : > { %s2522_s1 = sshll.u32 %s2627_s15, 4  ;;  %s2523_s1 = int_to_ptr.vmem [resolvable:$false] %s2522_s1 }
  0x50   : > { %p2520_p13 = pnand %p2518_p10, %p2422_p3  ;;  %s2524_s6 = scalar_lea.vmem %s2523_s1, 8192 }
  0x51   : > { %p2525_p1 = scmp.lt.s32.totalorder %s321_s10, %s2523_s1  ;;  %p2526_p2 = scmp.lt.s32.totalorder %s2524_s6, %s2517_s20 }
  0x52   : > { %p2521_p12 = pneg %p2520_p13 }
  0x53   : > { %p2527_p5 = por %p2526_p2, %p2525_p1 }
  0x55   : > { %p2528_p6 = pnand %p2527_p5, %p2521_p12 }
  0x57   : > { %2531 = shalt.err (!%p2528_p6)
}
  0x58   : > { %s2628_s21 = smov 256   ;;  %s2629_s8 = smov 16  }
  0x59   : > { %2144 = dma.hbm_to_vmem [thread:$0]  (!%p2748_p0), %s319_s12, 4096, %s321_s10, %s308_s19, %s2628_s21, %s2628_s21, %s2629_s8  }
  0x5a   : > { %332 = sbr.rel (%p2777_p4) target bundleno = 1214 (0x4be), region = 44 }
  0x5f   : > { %s2828_s13 = sand.u32 1, %s2604_s22  }
  0x60   : > { %s2019_s17 = sshll.u32 %s2828_s13, 7  ;;  %s335_s23 = scalar_lea.sflag [#allocation3], %s2828_s13 }
  0x61   : > { %s2832_s11 = scalar_lea.vmem [#allocation2], %s2019_s17 }
  0x62   : > { %2583 = dma.done.wait (%p2720_p8), %s335_s23, 2048  }
  0x63   : > { %2585 = vsyncadd (%p2720_p8), %s335_s23, 4294965248  ;;  %s343_s16 = sand.u32 1, %s2700_s27   ;;  %s2839_s28 = scalar_lea.vmem [#allocation5], %s2019_s17 }
  0x64   : > { %s344_s29 = scalar_lea.sflag [#allocation6], %s343_s16 }
  0x65   : > { %2587 = dma.done.wait (%p2720_p8), %s344_s29, 4096  }
  0x66   : > { %2589 = vsyncadd (%p2720_p8), %s344_s29, 4294963200  ;;  %s2022_s14 = sshll.u32 %s2828_s13, 8  ;;  %s2846_s7 = scalar_lea.vmem [#allocation7], %s2019_s17 }
  0x67   : > { %s362_s30 = scalar_lea.sflag [#allocation9], %s2828_s13  ;;  %s2851_s12 = scalar_lea.vmem [#allocation8], %s2022_s14 }
  0x68   : > { %2591 = dma.done.wait (%p2720_p8), %s362_s30, 4096  }
  0x69   : > { %2593 = vsyncadd (%p2720_p8), %s362_s30, 4294963200  ;;  %v3753_v0 = vmov 0   ;;  %v2208_v1 = vld [vmem:[%s2839_s28] ss:$8 sps:$4 sm:$0xff]   ;;  %v2210_v2 = vld [vmem:[%s2839_s28 + $0x10] ss:$8 sps:$4 sm:$0xff]  }
  0x6a   : > { %669 = vmatprep.mubr.bf16.mxu0 %v3753_v0  ;;  %525 = vxpose.xlu0.c.b16.start [1/8] %v2208_v1, 128  ;;  %v2212_v3 = vld [vmem:[%s2839_s28 + $0x20] ss:$8 sps:$4 sm:$0xff]   ;;  %v2214_v4 = vld [vmem:[%s2839_s28 + $0x30] ss:$8 sps:$4 sm:$0xff]   ;;  %v2224_v5 = vld [vmem:[%s2839_s28 + $0x4] ss:$8 sps:$4 sm:$0xff]  }
  0x6b   : > { %v2225_v6 = vld [vmem:[%s2832_s11 + $0x74] ss:$8 sps:$4 sm:$0xff]   ;;  %v2227_v7 = vld [vmem:[%s2832_s11 + $0x70] ss:$8 sps:$4 sm:$0xff]   ;;  %541 = vxpose.xlu1.c.b16.start [1/8] %v2224_v5, 128  ;;  %v2229_v9 = vld [vmem:[%s2832_s11 + $0x64] ss:$8 sps:$4 sm:$0xff]  }
  0x6c   : > { %v2228_v8 = vld [vmem:[%s2839_s28 + $0x14] ss:$8 sps:$4 sm:$0xff]   ;;  %637 = vmatprep.subr.bf16.mxu0 %v2225_v6  ;;  %v2231_v10 = vld [vmem:[%s2832_s11 + $0x60] ss:$8 sps:$4 sm:$0xff]   ;;  %v2232_v13 = vld [vmem:[%s2839_s28 + $0x24] ss:$8 sps:$4 sm:$0xff]  }
  0x6d   : > { %638 = vmatpush1.bf16.msra.mxu0 %v2227_v7  ;;  %v2233_v11 = vld [vmem:[%s2832_s11 + $0x54] ss:$8 sps:$4 sm:$0xff]   ;;  %v2216_v12 = vld [vmem:[%s2839_s28 + $0x40] ss:$8 sps:$4 sm:$0xff]   ;;  %v2235_v14 = vld [vmem:[%s2832_s11 + $0x50] ss:$8 sps:$4 sm:$0xff]  }
  0x6e   : > { %526 = vxpose.xlu0.c.b16.cont [2/8] %v2210_v2, 128  ;;  %639 = vmatprep.subr.bf16.mxu0 %v2229_v9  ;;  %v2218_v15 = vld [vmem:[%s2839_s28 + $0x50] ss:$8 sps:$4 sm:$0xff]   ;;  %v2237_v16 = vld [vmem:[%s2832_s11 + $0x44] ss:$8 sps:$4 sm:$0xff]   ;;  %v2236_v17 = vld [vmem:[%s2839_s28 + $0x34] ss:$8 sps:$4 sm:$0xff]  }
  0x6f   : > { %542 = vxpose.xlu1.c.b16.cont [2/8] %v2228_v8, 128  ;;  %v2239_v18 = vld [vmem:[%s2832_s11 + $0x40] ss:$8 sps:$4 sm:$0xff]   ;;  %v2240_v20 = vld [vmem:[%s2839_s28 + $0x44] ss:$8 sps:$4 sm:$0xff]   ;;  %v2241_v21 = vld [vmem:[%s2832_s11 + $0x34] ss:$8 sps:$4 sm:$0xff]  }
  0x70   : > { %v2220_v19 = vld [vmem:[%s2839_s28 + $0x60] ss:$8 sps:$4 sm:$0xff]   ;;  %v2243_v22 = vld [vmem:[%s2832_s11 + $0x30] ss:$8 sps:$4 sm:$0xff]   ;;  %v2245_v23 = vld [vmem:[%s2832_s11 + $0x24] ss:$8 sps:$4 sm:$0xff]  }
  0x71   : > { %640 = vmatpush1.bf16.msra.mxu0 %v2231_v10  ;;  %v2222_v24 = vld [vmem:[%s2839_s28 + $0x70] ss:$8 sps:$4 sm:$0xff]   ;;  %v2244_v25 = vld [vmem:[%s2839_s28 + $0x54] ss:$8 sps:$4 sm:$0xff]   ;;  %v2247_v26 = vld [vmem:[%s2832_s11 + $0x20] ss:$8 sps:$4 sm:$0xff]  }
  0x72   : > { %527 = vxpose.xlu0.c.b16.cont [3/8] %v2212_v3, 128  ;;  %641 = vmatprep.subr.bf16.mxu0 %v2233_v11  ;;  %v2249_v27 = vld [vmem:[%s2832_s11 + $0x14] ss:$8 sps:$4 sm:$0xff]   ;;  %v2248_v28 = vld [vmem:[%s2839_s28 + $0x64] ss:$8 sps:$4 sm:$0xff]   ;;  %v2251_v29 = vld [vmem:[%s2832_s11 + $0x10] ss:$8 sps:$4 sm:$0xff]  }
  0x73   : > { %543 = vxpose.xlu1.c.b16.cont [3/8] %v2232_v13, 128  ;;  %v2253_v30 = vld [vmem:[%s2832_s11 + $0x4] ss:$8 sps:$4 sm:$0xff]   ;;  %v2252_v31 = vld [vmem:[%s2839_s28 + $0x74] ss:$8 sps:$4 sm:$0xff]   ;;  %v2255_v32 = vld [vmem:[%s2832_s11] ss:$8 sps:$4 sm:$0xff]  }
  0x74   : > { %s3619_s8 = scalar_lea.vmem [#allocation10], %s2022_s14  ;;  %s2089_s17 = sshll.u32 %s2612_s24, 12 }
  0x75   : > { %642 = vmatpush1.bf16.msra.mxu0 %v2235_v14  ;;  %s1846_s23 = sshll.u32 %s3619_s8, 4  ;;  %s3842_s29 = sld [smem:[#allocation37_spill]]  ;;  %s3687_s23 = int_to_ptr.vmem [resolvable:$true] %s1846_s23 }
  0x76   : > { %528 = vxpose.xlu0.c.b16.cont [4/8] %v2214_v4, 128  ;;  %643 = vmatprep.subr.bf16.mxu0 %v2237_v16  ;;  %s1831_s24 = scalar_lea.sflag [#allocation4], %s2828_s13 }
  0x77   : > { %544 = vxpose.xlu1.c.b16.cont [4/8] %v2236_v17, 128 }
  0x79   : > { %644 = vmatpush1.bf16.msra.mxu0 %v2239_v18 }
  0x7a   : > { %529 = vxpose.xlu0.c.b16.cont [5/8] %v2216_v12, 128  ;;  %645 = vmatprep.subr.bf16.mxu0 %v2241_v21 }
  0x7b   : > { %545 = vxpose.xlu1.c.b16.cont [5/8] %v2240_v20, 128  ;;  %s3685_s28 = scalar_lea.hbm %s3842_s29, %s2089_s17 }
  0x7d   : > { %646 = vmatpush1.bf16.msra.mxu0 %v2243_v22 }
  0x7e   : > { %530 = vxpose.xlu0.c.b16.cont [6/8] %v2218_v15, 128  ;;  %647 = vmatprep.subr.bf16.mxu0 %v2245_v23 }
  0x7f   : > { %546 = vxpose.xlu1.c.b16.cont [6/8] %v2244_v25, 128 }
  0x81   : > { %648 = vmatpush1.bf16.msra.mxu0 %v2247_v26 }
  0x82   : > { %531 = vxpose.xlu0.c.b16.cont [7/8] %v2220_v19, 128  ;;  %649 = vmatprep.subr.bf16.mxu0 %v2249_v27 }
  0x83   : > { %547 = vxpose.xlu1.c.b16.cont [7/8] %v2248_v28, 128 }
  0x85   : > { %650 = vmatpush1.bf16.msra.mxu0 %v2251_v29 }
  0x86   : > { %532 = vxpose.xlu0.c.b16.end [8/8] %v2222_v24, 128  ;;  %651 = vmatprep.subr.bf16.mxu0 %v2253_v30 }
  0x87   : > { %548 = vxpose.xlu1.c.b16.end [8/8] %v2252_v31, 128 }
  0x89   : > { %652 = vmatpush1.bf16.msra.mxu0 %v2255_v32 }
  0x8b   : > { %2207 = vset.pattern.permute.xlu1 %v3753_v0 }
  0x8f   : > { %2206 = vset.pattern.permute.xlu0 %v3753_v0 }
  0xcc   : > { %v533_v33 = vpop.trf.xlu0 }
  0xcd   : > { %670 = vmatmul.mubr.bf16.vlgmr.msra.gmra.mxu0 %v533_v33  ;;  %v549_v41 = vpop.trf.xlu1 }
  0xce   : > { %679 = vmatprep.mubr.bf16.mxu0 %v3753_v0 }
  0xd0   : > { %v534_v34 = vpop.trf.xlu0 }
  0xd1   : > { %v550_v42 = vpop.trf.xlu1 }
  0xd4   : > { %v535_v35 = vpop.trf.xlu0 }
  0xd5   : > { %680 = vmatmul.mubr.bf16.gmra.mxu0 %v534_v34  ;;  %v551_v43 = vpop.trf.xlu1 }
  0xd6   : > { %689 = vmatprep.mubr.bf16.mxu0 %v3753_v0 }
  0xd8   : > { %v536_v36 = vpop.trf.xlu0 }
  0xd9   : > { %v552_v44 = vpop.trf.xlu1 }
  0xdc   : > { %v537_v37 = vpop.trf.xlu0 }
  0xdd   : > { %690 = vmatmul.mubr.bf16.gmra.mxu0 %v535_v35  ;;  %v553_v45 = vpop.trf.xlu1 }
  0xde   : > { %699 = vmatprep.mubr.bf16.mxu0 %v3753_v0 }
  0xe0   : > { %v538_v38 = vpop.trf.xlu0 }
  0xe1   : > { %v554_v46 = vpop.trf.xlu1 }
  0xe4   : > { %v539_v39 = vpop.trf.xlu0 }
  0xe5   : > { %700 = vmatmul.mubr.bf16.gmra.mxu0 %v536_v36  ;;  %v555_v47 = vpop.trf.xlu1 }
  0xe6   : > { %709 = vmatprep.mubr.bf16.mxu0 %v3753_v0 }
  0xe8   : > { %v540_v40 = vpop.trf.xlu0 }
  0xe9   : > { %v556_v48 = vpop.trf.xlu1 }
  0xed   : > { %710 = vmatmul.mubr.bf16.gmra.mxu0 %v537_v37 }
  0xee   : > { %719 = vmatprep.mubr.bf16.mxu0 %v3753_v0 }
  0xf5   : > { %720 = vmatmul.mubr.bf16.gmra.mxu0 %v538_v38 }
  0xf6   : > { %729 = vmatprep.mubr.bf16.mxu0 %v3753_v0 }
  0xfd   : > { %730 = vmatmul.mubr.bf16.gmra.mxu0 %v539_v39 }
  0xfe   : > { %739 = vmatprep.mubr.bf16.mxu0 %v3753_v0 }
 0x105   : > { %740 = vmatmul.mubr.bf16.gmra.mxu0 %v540_v40 }
 0x106   : > { %749 = vmatprep.mubr.bf16.mxu0 %v3753_v0 }
 0x10d   : > { %750 = vmatmul.mubr.bf16.gmra.mxu0 %v549_v41 }
 0x10e   : > { %759 = vmatprep.mubr.bf16.mxu0 %v3753_v0 }
 0x115   : > { %760 = vmatmul.mubr.bf16.gmra.mxu0 %v550_v42 }
 0x116   : > { %769 = vmatprep.mubr.bf16.mxu0 %v3753_v0 }
 0x11d   : > { %770 = vmatmul.mubr.bf16.gmra.mxu0 %v551_v43 }
 0x11e   : > { %779 = vmatprep.mubr.bf16.mxu0 %v3753_v0 }
 0x125   : > { %780 = vmatmul.mubr.bf16.gmra.mxu0 %v552_v44 }
 0x126   : > { %789 = vmatprep.mubr.bf16.mxu0 %v3753_v0 }
 0x12d   : > { %790 = vmatmul.mubr.bf16.gmra.mxu0 %v553_v45 }
 0x12e   : > { %799 = vmatprep.mubr.bf16.mxu0 %v3753_v0 }
 0x135   : > { %800 = vmatmul.mubr.bf16.gmra.mxu0 %v554_v46 }
 0x136   : > { %809 = vmatprep.mubr.bf16.mxu0 %v3753_v0 }
 0x13d   : > { %810 = vmatmul.mubr.bf16.gmra.mxu0 %v555_v47 }
 0x13e   : > { %819 = vmatprep.mubr.bf16.mxu0 %v3753_v0 }
 0x145   : > { %820 = vmatmul.mubr.bf16.gmra.mxu0 %v556_v48 }
 0x18d   : > { %v2907_v49 = vpop.f32.mrf.mxu0 }
 0x18f   : > { %v2909_v50 = vpop.f32.mrf.mxu0 }
 0x191   : > { %v2911_v51 = vpop.f32.mrf.mxu0 }
 0x193   : > { %v2913_v52 = vpop.f32.mrf.mxu0 }
 0x195   : > { %v2915_v53 = vpop.f32.mrf.mxu0 }
 0x196   : > { %v830_v35 = vmax.f32 %v2907_v49, %v2915_v53 }
 0x197   : > { %v2917_v54 = vpop.f32.mrf.mxu0 }
 0x199   : > { %v2919_v55 = vpop.f32.mrf.mxu0 }
 0x19a   : > { %v831_v36 = vmax.f32 %v2911_v51, %v2919_v55 }
 0x19b   : > { %v2921_v56 = vpop.f32.mrf.mxu0 }
 0x19c   : > { %3794 = vst [vmem:[#allocation21_spill] sm:$0xff] %v2921_v56 }
 0x19d   : > { %v2923_v57 = vpop.f32.mrf.mxu0 }
 0x19e   : > { %v832_v38 = vmax.f32 %v830_v35, %v2923_v57 }
 0x19f   : > { %v2925_v58 = vpop.f32.mrf.mxu0 }
 0x1a1   : > { %v2927_v59 = vpop.f32.mrf.mxu0 }
 0x1a2   : > { %v833_v39 = vmax.f32 %v831_v36, %v2927_v59 }
 0x1a3   : > { %v2929_v60 = vpop.f32.mrf.mxu0 }
 0x1a4   : > { %3795 = vst [vmem:[#allocation22_spill] sm:$0xff] %v2929_v60 }
 0x1a5   : > { %v2931_v61 = vpop.f32.mrf.mxu0 }
 0x1a6   : > { %v834_v41 = vmax.f32 %v832_v38, %v2931_v61 }
 0x1a7   : > { %v2933_v62 = vpop.f32.mrf.mxu0 }
 0x1a9   : > { %v2935_v63 = vpop.f32.mrf.mxu0 }
 0x1aa   : > { %v835_v42 = vmax.f32 %v833_v39, %v2935_v63 }
 0x1ab   : > { %v2937_v1 = vpop.f32.mrf.mxu0 }
 0x1ac   : > { %3796 = vst [vmem:[#allocation23_spill] sm:$0xff] %v2937_v1 }
 0x1ad   : > { %v2939_v2 = vpop.f32.mrf.mxu0 }
 0x1ae   : > { %3797 = vst [vmem:[#allocation24_spill] sm:$0xff] %v2939_v2  ;;  %v836_v44 = vmax.f32 %v834_v41, %v2939_v2 }
 0x1af   : > { %v2941_v3 = vpop.f32.mrf.mxu0 }
 0x1b0   : > { %3798 = vst [vmem:[#allocation25_spill] sm:$0xff] %v2941_v3 }
 0x1b1   : > { %v2943_v4 = vpop.f32.mrf.mxu0 }
 0x1b2   : > { %v837_v45 = vmax.f32 %v835_v42, %v2943_v4 }
 0x1b3   : > { %v2945_v5 = vpop.f32.mrf.mxu0 }
 0x1b4   : > { %3799 = vst [vmem:[#allocation26_spill] sm:$0xff] %v2945_v5 }
 0x1b5   : > { %v2947_v6 = vpop.f32.mrf.mxu0 }
 0x1b6   : > { %3800 = vst [vmem:[#allocation27_spill] sm:$0xff] %v2947_v6  ;;  %v838_v47 = vmax.f32 %v836_v44, %v2947_v6 }
 0x1b7   : > { %v2949_v7 = vpop.f32.mrf.mxu0 }
 0x1b9   : > { %v2951_v8 = vpop.f32.mrf.mxu0 }
 0x1ba   : > { %v839_v48 = vmax.f32 %v837_v45, %v2951_v8 }
 0x1bb   : > { %v2953_v9 = vpop.f32.mrf.mxu0 }
 0x1bd   : > { %v2955_v10 = vpop.f32.mrf.mxu0 }
 0x1be   : > { %3801 = vst [vmem:[#allocation28_spill] sm:$0xff] %v2955_v10  ;;  %v840_v36 = vmax.f32 %v838_v47, %v2955_v10 }
 0x1bf   : > { %v2957_v11 = vpop.f32.mrf.mxu0 }
 0x1c1   : > { %v2959_v12 = vpop.f32.mrf.mxu0 }
 0x1c2   : > { %v841_v38 = vmax.f32 %v839_v48, %v2959_v12  ;;  %v868_v48 = vmax.f32 %v2913_v52, %v2921_v56 }
 0x1c3   : > { %v2961_v13 = vpop.f32.mrf.mxu0 }
 0x1c5   : > { %v2963_v14 = vpop.f32.mrf.mxu0 }
 0x1c6   : > { %v842_v39 = vmax.f32 %v840_v36, %v2963_v14 }
 0x1c7   : > { %v2965_v15 = vpop.f32.mrf.mxu0 }
 0x1c9   : > { %v2967_v16 = vpop.f32.mrf.mxu0 }
 0x1ca   : > { %3802 = vst [vmem:[#allocation29_spill] sm:$0xff] %v2967_v16  ;;  %v843_v41 = vmax.f32 %v841_v38, %v2967_v16 }
 0x1cb   : > { %v2969_v17 = vpop.f32.mrf.mxu0 }
 0x1cd   : > { %v2971_v18 = vpop.f32.mrf.mxu0 }
 0x1ce   : > { %v844_v42 = vmax.f32 %v842_v39, %v2971_v18  ;;  %v867_v39 = vmax.f32 %v2909_v50, %v2917_v54 }
 0x1cf   : > { %v2973_v19 = vpop.f32.mrf.mxu0 }
 0x1d1   : > { %v2975_v20 = vpop.f32.mrf.mxu0 }
 0x1d2   : > { %v845_v44 = vmax.f32 %v843_v41, %v2975_v20  ;;  %v870_v41 = vmax.f32 %v868_v48, %v2929_v60 }
 0x1d3   : > { %v2977_v21 = vpop.f32.mrf.mxu0 }
 0x1d4   : > { %v872_v56 = vmax.f32 %v870_v41, %v2937_v1 }
 0x1d5   : > { %v2979_v22 = vpop.f32.mrf.mxu0 }
 0x1d6   : > { %3803 = vst [vmem:[#allocation30_spill] sm:$0xff] %v2979_v22  ;;  %v846_v45 = vmax.f32 %v844_v42, %v2979_v22  ;;  %v869_v22 = vmax.f32 %v867_v39, %v2925_v58  ;;  %v874_v48 = vmax.f32 %v872_v56, %v2945_v5 }
 0x1d7   : > { %v2981_v23 = vpop.f32.mrf.mxu0 }
 0x1d8   : > { %v876_v41 = vmax.f32 %v874_v48, %v2953_v9 }
 0x1d9   : > { %v2983_v24 = vpop.f32.mrf.mxu0 }
 0x1da   : > { %3804 = vst [vmem:[#allocation31_spill] sm:$0xff] %v2983_v24  ;;  %v847_v47 = vmax.f32 %v845_v44, %v2983_v24  ;;  %v878_v56 = vmax.f32 %v876_v41, %v2961_v13 }
 0x1db   : > { %v2985_v25 = vpop.f32.mrf.mxu0 }
 0x1dd   : > { %v2987_v26 = vpop.f32.mrf.mxu0 }
 0x1de   : > { %3805 = vst [vmem:[#allocation32_spill] sm:$0xff] %v2987_v26  ;;  %v848_v36 = vmax.f32 %v846_v45, %v2987_v26  ;;  %v871_v26 = vmax.f32 %v869_v22, %v2933_v62 }
 0x1df   : > { %v2989_v27 = vpop.f32.mrf.mxu0 }
 0x1e0   : > { %v873_v39 = vmax.f32 %v871_v26, %v2941_v3  ;;  %v880_v26 = vmax.f32 %v878_v56, %v2969_v17 }
 0x1e1   : > { %v2991_v28 = vpop.f32.mrf.mxu0 }
 0x1e2   : > { %3806 = vst [vmem:[#allocation33_spill] sm:$0xff] %v2991_v28  ;;  %v849_v38 = vmax.f32 %v847_v47, %v2991_v28  ;;  %v875_v22 = vmax.f32 %v873_v39, %v2949_v7 }
 0x1e3   : > { %v2993_v29 = vpop.f32.mrf.mxu0 }
 0x1e4   : > { %v877_v5 = vmax.f32 %v875_v22, %v2957_v11 }
 0x1e5   : > { %v2995_v30 = vpop.f32.mrf.mxu0 }
 0x1e6   : > { %v850_v42 = vmax.f32 %v848_v36, %v2995_v30  ;;  %v879_v48 = vmax.f32 %v877_v5, %v2965_v15 }
 0x1e7   : > { %v2997_v31 = vpop.f32.mrf.mxu0 }
 0x1e9   : > { %v2999_v32 = vpop.f32.mrf.mxu0 }
 0x1ea   : > { %v851_v44 = vmax.f32 %v849_v38, %v2999_v32 }
 0x1eb   : > { %v3001_v33 = vpop.f32.mrf.mxu0 }
 0x1ed   : > { %v3003_v34 = vpop.f32.mrf.mxu0 }
 0x1ee   : > { %v852_v45 = vmax.f32 %v850_v42, %v3003_v34 }
 0x1ef   : > { %v3009_v37 = vpop.f32.mrf.mxu0 }
 0x1f1   : > { %v3013_v40 = vpop.f32.mrf.mxu0 }
 0x1f2   : > { %v853_v47 = vmax.f32 %v851_v44, %v3013_v40 }
 0x1f3   : > { %v3017_v43 = vpop.f32.mrf.mxu0 }
 0x1f5   : > { %v3021_v46 = vpop.f32.mrf.mxu0 }
 0x1f6   : > { %v854_v36 = vmax.f32 %v852_v45, %v3021_v46 }
 0x1f7   : > { %v3025_v35 = vpop.f32.mrf.mxu0 }
 0x1f9   : > { %v3029_v0 = vpop.f32.mrf.mxu0 }
 0x1fa   : > { %v855_v38 = vmax.f32 %v853_v47, %v3029_v0 }
 0x1fb   : > { %v3033_v2 = vpop.f32.mrf.mxu0 }
 0x1fd   : > { %v3037_v6 = vpop.f32.mrf.mxu0 }
 0x1fe   : > { %3807 = vst [vmem:[#allocation34_spill] sm:$0xff] %v3037_v6  ;;  %v856_v42 = vmax.f32 %v854_v36, %v3037_v6  ;;  %v882_v36 = vmax.f32 %v880_v26, %v2977_v21 }
 0x1ff   : > { %v3041_v10 = vpop.f32.mrf.mxu0 }
 0x200   : > { %v884_v39 = vmax.f32 %v882_v36, %v2985_v25 }
 0x201   : > { %v3047_v16 = vpop.f32.mrf.mxu0 }
 0x202   : > { %3808 = vst [vmem:[#allocation35_spill] sm:$0xff] %v3047_v16  ;;  %v857_v44 = vmax.f32 %v855_v38, %v3047_v16  ;;  %v881_v16 = vmax.f32 %v879_v48, %v2973_v19 }
 0x203   : > { %v3054_v24 = vpop.f32.mrf.mxu0 }
 0x204   : > { %v883_v41 = vmax.f32 %v881_v16, %v2981_v23 }
 0x205   : > { %v3060_v28 = vpop.f32.mrf.mxu0 }
 0x206   : > { %v858_v45 = vmax.f32 %v856_v42, %v3060_v28  ;;  %v886_v42 = vmax.f32 %v884_v39, %v2993_v29  ;;  %v885_v22 = vmax.f32 %v883_v41, %v2989_v27 }
 0x207   : > { %v3066_v60 = vpop.f32.mrf.mxu0 }
 0x208   : > { %v888_v56 = vmax.f32 %v886_v42, %v3001_v33  ;;  %v887_v5 = vmax.f32 %v885_v22, %v2997_v31 }
 0x209   : > { %v3072_v1 = vpop.f32.mrf.mxu0 }
 0x20a   : > { %v859_v47 = vmax.f32 %v857_v44, %v3072_v1  ;;  %v889_v48 = vmax.f32 %v887_v5, %v3009_v37 }
 0x20b   : > { %v3092_v16 = vpop.f32.mrf.mxu0 }
 0x20c   : > { %v860_v3 = vmax.f32 %v858_v45, %v859_v47  ;;  %v890_v47 = vmax.f32 %v888_v56, %v3017_v43  ;;  %v891_v36 = vmax.f32 %v889_v48, %v3025_v35 }
 0x20e   : > { %v861_v38 = vrot.slane %v860_v3, 4 }
 0x210   : > { %v862_v6 = vmax.f32 %v860_v3, %v861_v38  ;;  %v892_v3 = vmax.f32 %v890_v47, %v3033_v2  ;;  %v2258_v47 = vld [vmem:[%s2846_s7 + $0x4] ss:$8 sps:$4 sm:$0xff]  }
 0x211   : > { %1330 = vmatprep.mubr.bf16.mxu0 %v2258_v47 }
 0x212   : > { %v863_v44 = vrot.slane %v862_v6, 2  ;;  %v894_v38 = vmax.f32 %v892_v3, %v3054_v24 }
 0x214   : > { %v864_v45 = vmax.f32 %v862_v6, %v863_v44  ;;  %v893_v6 = vmax.f32 %v891_v36, %v3041_v10  ;;  %v896_v41 = vmax.f32 %v894_v38, %v3092_v16 }
 0x216   : > { %v865_v26 = vrot.slane %v864_v45, 1  ;;  %v895_v42 = vmax.f32 %v893_v6, %v3066_v60 }
 0x218   : > { %v3096_v39 = vmax.f32 %v864_v45, %v865_v26  ;;  %v897_v5 = vmax.f32 %v895_v42, %v896_v41  ;;  %v2261_v26 = vld [vmem:[%s2846_s7 + $0x24] ss:$8 sps:$4 sm:$0xff]  }
 0x219   : > { %1350 = vmatprep.mubr.bf16.mxu1 %v2261_v26 }
 0x21a   : > { %v904_v44 = vsub.f32 %v2907_v49, %v3096_v39  ;;  %v906_v22 = vsub.f32 %v2911_v51, %v3096_v39  ;;  %v908_v56 = vsub.f32 %v2915_v53, %v3096_v39  ;;  %v910_v45 = vsub.f32 %v2919_v55, %v3096_v39 }
 0x21b   : > { %v912_v36 = vsub.f32 %v2923_v57, %v3096_v39  ;;  %v898_v49 = vrot.slane %v897_v5, 4  ;;  %v914_v51 = vsub.f32 %v2927_v59, %v3096_v39  ;;  %v916_v6 = vsub.f32 %v2931_v61, %v3096_v39 }
 0x21c   : > { %v968_v48 = vmul.f32 1.442695, %v904_v44  ;;  %v972_v3 = vmul.f32 1.442695, %v906_v22  ;;  %v976_v38 = vmul.f32 1.442695, %v908_v56  ;;  %v918_v42 = vsub.f32 %v2935_v63, %v3096_v39 }
 0x21d   : > { %v980_v53 = vmul.f32 1.442695, %v910_v45  ;;  %v984_v55 = vmul.f32 1.442695, %v912_v36  ;;  %v899_v41 = vmax.f32 %v897_v5, %v898_v49  ;;  %v988_v57 = vmul.f32 1.442695, %v914_v51 }
 0x21e   : > { %2288 = vpow2.f32 %v968_v48  ;;  %v3809_v44 = vld [vmem:[#allocation24_spill] sm:$0xff]  ;;  %v992_v56 = vmul.f32 1.442695, %v916_v6  ;;  %v922_v59 = vsub.f32 %v2943_v4, %v3096_v39  ;;  %v3810_v45 = vld [vmem:[#allocation27_spill] sm:$0xff]  ;;  %v996_v26 = vmul.f32 1.442695, %v918_v42 }
 0x21f   : > { %2290 = vpow2.f32 %v972_v3  ;;  %v920_v22 = vsub.f32 %v3809_v44, %v3096_v39  ;;  %v900_v47 = vrot.slane %v899_v41, 2  ;;  %v924_v61 = vsub.f32 %v3810_v45, %v3096_v39  ;;  %v3811_v63 = vld [vmem:[#allocation28_spill] sm:$0xff] }
 0x220   : > { %2292 = vpow2.f32 %v976_v38  ;;  %v926_v5 = vsub.f32 %v2951_v8, %v3096_v39  ;;  %v928_v48 = vsub.f32 %v3811_v63, %v3096_v39  ;;  %v930_v36 = vsub.f32 %v2959_v12, %v3096_v39 }
 0x221   : > { %2294 = vpow2.f32 %v980_v53  ;;  %v1000_v3 = vmul.f32 1.442695, %v920_v22  ;;  %v1004_v38 = vmul.f32 1.442695, %v922_v59  ;;  %v901_v49 = vmax.f32 %v899_v41, %v900_v47 }
 0x222   : > { %2296 = vpow2.f32 %v984_v55  ;;  %v932_v51 = vsub.f32 %v2963_v14, %v3096_v39  ;;  %v1008_v53 = vmul.f32 1.442695, %v924_v61  ;;  %v948_v8 = vsub.f32 %v2995_v30, %v3096_v39 }
 0x223   : > { %2298 = vpow2.f32 %v988_v57  ;;  %v1012_v55 = vmul.f32 1.442695, %v926_v5  ;;  %v950_v42 = vsub.f32 %v2999_v32, %v3096_v39  ;;  %v1016_v12 = vmul.f32 1.442695, %v928_v48 }
 0x224   : > { %2300 = vpow2.f32 %v992_v56  ;;  %v952_v14 = vsub.f32 %v3003_v34, %v3096_v39  ;;  %v1020_v44 = vmul.f32 1.442695, %v930_v36  ;;  %v902_v22 = vrot.slane %v901_v49, 1 }
 0x225   : > { %2302 = vpow2.f32 %v996_v26  ;;  %v954_v30 = vsub.f32 %v3013_v40, %v3096_v39  ;;  %v1024_v56 = vmul.f32 1.442695, %v932_v51  ;;  %v956_v47 = vsub.f32 %v3021_v46, %v3096_v39  ;;  %v3813_v40 = vld [vmem:[#allocation29_spill] sm:$0xff] }
 0x226   : > { %2304 = vpow2.f32 %v1000_v3  ;;  %v1056_v45 = vmul.f32 1.442695, %v948_v8  ;;  %v958_v34 = vsub.f32 %v3029_v0, %v3096_v39  ;;  %v1060_v61 = vmul.f32 1.442695, %v950_v42  ;;  %v3814_v8 = vld [vmem:[#allocation30_spill] sm:$0xff] }
 0x227   : > { %2306 = vpow2.f32 %v1004_v38  ;;  %v934_v63 = vsub.f32 %v3813_v40, %v3096_v39  ;;  %v1064_v48 = vmul.f32 1.442695, %v952_v14  ;;  %v3161_v3 = vmax.f32 %v901_v49, %v902_v22 }
 0x228   : > { %2308 = vpow2.f32 %v1008_v53  ;;  %v936_v46 = vsub.f32 %v2971_v18, %v3096_v39  ;;  %v1068_v36 = vmul.f32 1.442695, %v954_v30  ;;  %v938_v51 = vsub.f32 %v2975_v20, %v3096_v39  ;;  %v3815_v30 = vld [vmem:[#allocation31_spill] sm:$0xff] }
 0x229   : > { %2310 = vpow2.f32 %v1012_v55  ;;  %v1072_v53 = vmul.f32 1.442695, %v956_v47  ;;  %v940_v55 = vsub.f32 %v3814_v8, %v3096_v39  ;;  %v1076_v49 = vmul.f32 1.442695, %v958_v34 }
 0x22a   : > { %2312 = vpow2.f32 %v1016_v12  ;;  %v1028_v18 = vmul.f32 1.442695, %v934_v63  ;;  %v1032_v14 = vmul.f32 1.442695, %v936_v46 }
 0x22b   : > { %v3131_v4 = vpop.eup %2288  ;;  %2314 = vpow2.f32 %v1020_v44  ;;  %v907_v44 = vsub.f32 %v2913_v52, %v3161_v3  ;;  %v1040_v47 = vmul.f32 1.442695, %v940_v55 }
 0x22c   : > { %v3135_v6 = vpop.eup %2290  ;;  %2316 = vpow2.f32 %v1024_v56  ;;  %v942_v56 = vsub.f32 %v3815_v30, %v3096_v39 }
 0x22d   : > { %3812 = vst [vmem:[#allocation24_spill] sm:$0xff] %v3135_v6  ;;  %v1096_v41 = vadd.f32 %v3135_v6, %v3131_v4  ;;  %v3143_v57 = vpop.eup %2292  ;;  %2318 = vpow2.f32 %v1056_v45 }
 0x22e   : > { %v3150_v59 = vpop.eup %2294  ;;  %2320 = vpow2.f32 %v1060_v61  ;;  %v3816_v61 = vld [vmem:[#allocation32_spill] sm:$0xff] }
 0x22f   : > { %v1097_v32 = vadd.f32 %v3143_v57, %v1096_v41  ;;  %v3157_v5 = vpop.eup %2296  ;;  %2322 = vpow2.f32 %v1064_v48  ;;  %v905_v41 = vsub.f32 %v2909_v50, %v3161_v3  ;;  %v909_v50 = vsub.f32 %v2917_v54, %v3161_v3  ;;  %v3817_v48 = vld [vmem:[#allocation21_spill] sm:$0xff] }
 0x230   : > { %v3166_v38 = vpop.eup %2298  ;;  %2324 = vpow2.f32 %v1068_v36  ;;  %v911_v46 = vsub.f32 %v3817_v48, %v3161_v3  ;;  %v974_v36 = vmul.f32 1.442695, %v907_v44  ;;  %v3818_v54 = vld [vmem:[#allocation33_spill] sm:$0xff] }
 0x231   : > { %v1098_v26 = vadd.f32 %v3150_v59, %v1097_v32  ;;  %v3173_v12 = vpop.eup %2300  ;;  %v1036_v32 = vmul.f32 1.442695, %v938_v51  ;;  %2326 = vpow2.f32 %v1072_v53  ;;  %v970_v52 = vmul.f32 1.442695, %v905_v41 }
 0x232   : > { %v3180_v22 = vpop.eup %2302  ;;  %2328 = vpow2.f32 %v1076_v49  ;;  %v946_v51 = vsub.f32 %v3818_v54, %v3096_v39  ;;  %v1044_v53 = vmul.f32 1.442695, %v942_v56  ;;  %v913_v49 = vsub.f32 %v2925_v58, %v3161_v3 }
 0x233   : > { %v1099_v0 = vadd.f32 %v3157_v5, %v1098_v26  ;;  %v3187_v34 = vpop.eup %2304  ;;  %v944_v26 = vsub.f32 %v3816_v61, %v3096_v39  ;;  %2330 = vpow2.f32 %v1028_v18  ;;  %v917_v56 = vsub.f32 %v2933_v62, %v3161_v3 }
 0x234   : > { %v3191_v40 = vpop.eup %2306  ;;  %2332 = vpow2.f32 %v1032_v14  ;;  %v3819_v14 = vld [vmem:[#allocation22_spill] sm:$0xff]  ;;  %v1052_v58 = vmul.f32 1.442695, %v946_v51  ;;  %v986_v48 = vmul.f32 1.442695, %v913_v49  ;;  %v929_v62 = vsub.f32 %v2957_v11, %v3161_v3 }
 0x235   : > { %v1100_v42 = vadd.f32 %v3166_v38, %v1099_v0  ;;  %v3196_v0 = vpop.eup %2308  ;;  %2334 = vpow2.f32 %v1036_v32  ;;  %v1048_v41 = vmul.f32 1.442695, %v944_v26  ;;  %v982_v32 = vmul.f32 1.442695, %v911_v46 }
 0x236   : > { %v3200_v8 = vpop.eup %2310  ;;  %2336 = vpow2.f32 %v1040_v47  ;;  %v931_v46 = vsub.f32 %v2961_v13, %v3161_v3  ;;  %v933_v11 = vsub.f32 %v2965_v15, %v3161_v3  ;;  %v935_v13 = vsub.f32 %v2969_v17, %v3161_v3 }
 0x237   : > { %v1101_v20 = vadd.f32 %v3173_v12, %v1100_v42  ;;  %v978_v42 = vmul.f32 1.442695, %v909_v50  ;;  %v3205_v18 = vpop.eup %2312  ;;  %2338 = vpow2.f32 %v970_v52  ;;  %v3821_v52 = vld [vmem:[#allocation25_spill] sm:$0xff]  ;;  %v1018_v15 = vmul.f32 1.442695, %v929_v62 }
 0x238   : > { %v3209_v44 = vpop.eup %2314  ;;  %2340 = vpow2.f32 %v974_v36 }
 0x239   : > { %v1102_v45 = vadd.f32 %v3180_v22, %v1101_v20  ;;  %v915_v20 = vsub.f32 %v3819_v14, %v3161_v3  ;;  %v3214_v47 = vpop.eup %2316  ;;  %2342 = vpow2.f32 %v1044_v53 }
 0x23a   : > { %v3218_v61 = vpop.eup %2318  ;;  %2344 = vpow2.f32 %v978_v42 }
 0x23b   : > { %v1103_v63 = vadd.f32 %v3187_v34, %v1102_v45  ;;  %v3820_v45 = vld [vmem:[#allocation23_spill] sm:$0xff]  ;;  %v3223_v54 = vpop.eup %2320  ;;  %2346 = vpow2.f32 %v1048_v41  ;;  %v990_v36 = vmul.f32 1.442695, %v915_v20 }
 0x23c   : > { %v919_v50 = vsub.f32 %v3820_v45, %v3161_v3  ;;  %v3229_v51 = vpop.eup %2322  ;;  %2348 = vpow2.f32 %v982_v32  ;;  %v3234_v42 = vpack.c.bf16 %v3223_v54, %v3218_v61 }
 0x23d   : > { %v1104_v55 = vadd.f32 %v3191_v40, %v1103_v63  ;;  %v921_v63 = vsub.f32 %v3821_v52, %v3161_v3  ;;  %v3236_v49 = vpop.eup %2324  ;;  %2350 = vpow2.f32 %v1052_v58  ;;  %v3824_v58 = vld [vmem:[#allocation26_spill] sm:$0xff] }
 0x23e   : > { %3822 = vst [vmem:[#allocation27_spill] sm:$0xff] %v3234_v42  ;;  %v998_v41 = vmul.f32 1.442695, %v919_v50  ;;  %v3242_v14 = vpop.eup %2326  ;;  %2352 = vpow2.f32 %v986_v48  ;;  %v923_v45 = vsub.f32 %v3824_v58, %v3161_v3  ;;  %v1022_v50 = vmul.f32 1.442695, %v931_v46 }
 0x23f   : > { %v1105_v30 = vadd.f32 %v3196_v0, %v1104_v55  ;;  %v994_v55 = vmul.f32 1.442695, %v917_v56  ;;  %v3247_v56 = vpack.c.bf16 %v3236_v49, %v3229_v51  ;;  %v3249_v32 = vpop.eup %2328  ;;  %2354 = vpow2.f32 %v990_v36 }
 0x240   : > { %v3258_v52 = vpack.c.bf16 %v3249_v32, %v3242_v14  ;;  %v925_v48 = vsub.f32 %v2949_v7, %v3161_v3  ;;  %v927_v36 = vsub.f32 %v2953_v9, %v3161_v3  ;;  %v1030_v46 = vmul.f32 1.442695, %v935_v13 }
 0x241   : > { %v1106_v26 = vadd.f32 %v3200_v8, %v1105_v30  ;;  %v1002_v30 = vmul.f32 1.442695, %v921_v63  ;;  %3823 = vst [vmem:[#allocation28_spill] sm:$0xff] %v3247_v56  ;;  %2356 = vpow2.f32 %v994_v55  ;;  %v1006_v56 = vmul.f32 1.442695, %v923_v45  ;;  %v3831_v45 = vld [vmem:[#allocation35_spill] sm:$0xff] }
 0x242   : > { %3825 = vst [vmem:[#allocation29_spill] sm:$0xff] %v3258_v52  ;;  %2358 = vpow2.f32 %v998_v41  ;;  %v1014_v13 = vmul.f32 1.442695, %v927_v36 }
 0x243   : > { %v1107_v53 = vadd.f32 %v3205_v18, %v1106_v26  ;;  %v3253_v26 = vpop.eup %2330  ;;  %2360 = vpow2.f32 %v1002_v30 }
 0x244   : > { %v3260_v63 = vpop.eup %2332  ;;  %2362 = vpow2.f32 %v1018_v15 }
 0x245   : > { %v1108_v20 = vadd.f32 %v3209_v44, %v1107_v53  ;;  %3826 = vst [vmem:[#allocation30_spill] sm:$0xff] %v3260_v63  ;;  %v1026_v53 = vmul.f32 1.442695, %v933_v11  ;;  %v3264_v58 = vpop.eup %2334  ;;  %2364 = vpow2.f32 %v1022_v50  ;;  %v3829_v11 = vld [vmem:[#allocation34_spill] sm:$0xff]  ;;  %v962_v50 = vsub.f32 %v3831_v45, %v3096_v39 }
 0x246   : > { %3827 = vst [vmem:[#allocation31_spill] sm:$0xff] %v3264_v58  ;;  %v3269_v55 = vpop.eup %2336  ;;  %v960_v41 = vsub.f32 %v3829_v11, %v3096_v39  ;;  %v957_v11 = vsub.f32 %v3025_v35, %v3161_v3 }
 0x247   : > { %v1109_v17 = vadd.f32 %v3214_v47, %v1108_v20  ;;  %3828 = vst [vmem:[#allocation32_spill] sm:$0xff] %v3269_v55  ;;  %v3271_v20 = vpop.eup %2338  ;;  %2366 = vpow2.f32 %v1026_v53 }
 0x248   : > { %v3274_v7 = vpop.eup %2340  ;;  %2368 = vpow2.f32 %v1030_v46  ;;  %v1080_v46 = vmul.f32 1.442695, %v960_v41  ;;  %v966_v41 = vsub.f32 %v3072_v1, %v3096_v39 }
 0x249   : > { %v1110_v62 = vadd.f32 %v3253_v26, %v1109_v17  ;;  %v1010_v17 = vmul.f32 1.442695, %v925_v48  ;;  %v3278_v52 = vpop.eup %2342  ;;  %v1133_v30 = vadd.f32 %v3274_v7, %v3271_v20  ;;  %v964_v48 = vsub.f32 %v3060_v28, %v3096_v39 }
 0x24a   : > { %3830 = vst [vmem:[#allocation21_spill] sm:$0xff] %v3278_v52  ;;  %v3283_v15 = vpop.eup %2344  ;;  %2370 = vpow2.f32 %v1006_v56  ;;  %v939_v39 = vsub.f32 %v2977_v21, %v3161_v3 }
 0x24b   : > { %v1111_v42 = vadd.f32 %v3260_v63, %v1110_v62  ;;  %v3287_v62 = vpop.eup %2346  ;;  %2372 = vpow2.f32 %v1010_v17  ;;  %v959_v63 = vsub.f32 %v3033_v2, %v3161_v3  ;;  %v1088_v35 = vmul.f32 1.442695, %v964_v48 }
 0x24c   : > { %v3293_v36 = vpop.eup %2348  ;;  %2374 = vpow2.f32 %v1014_v13  ;;  %v937_v2 = vsub.f32 %v2973_v19, %v3161_v3  ;;  %v1074_v13 = vmul.f32 1.442695, %v957_v11 }
 0x24d   : > { %v1112_v9 = vadd.f32 %v3264_v58, %v1111_v42  ;;  %v1134_v42 = vadd.f32 %v3283_v15, %v1133_v30  ;;  %v3297_v58 = vpop.eup %2350  ;;  %2376 = vpow2.f32 %v1080_v46 }
 0x24e   : > { %v3303_v56 = vpop.eup %2352 }
 0x24f   : > { %v1113_v53 = vadd.f32 %v3269_v55, %v1112_v9  ;;  %v1135_v28 = vadd.f32 %v3293_v36, %v1134_v42  ;;  %v1084_v9 = vmul.f32 1.442695, %v962_v50  ;;  %v3305_v30 = vpop.eup %2354 }
 0x251   : > { %v1114_v45 = vadd.f32 %v3278_v52, %v1113_v53  ;;  %v1136_v55 = vadd.f32 %v3303_v56, %v1135_v28  ;;  %v3311_v53 = vpop.eup %2356  ;;  %v1078_v52 = vmul.f32 1.442695, %v959_v63  ;;  %2378 = vpow2.f32 %v1084_v9 }
 0x252   : > { %v3315_v42 = vpop.eup %2358  ;;  %2380 = vpow2.f32 %v1088_v35  ;;  %v941_v63 = vsub.f32 %v2981_v23, %v3161_v3  ;;  %v1034_v9 = vmul.f32 1.442695, %v937_v2  ;;  %v1200_v2 = vpack.c.bf16 %v3253_v26, %v3214_v47 }
 0x253   : > { %v1115_v17 = vadd.f32 %v3287_v62, %v1114_v45  ;;  %v1137_v6 = vadd.f32 %v3305_v30, %v1136_v55  ;;  %v3319_v1 = vpop.eup %2360  ;;  %v1092_v45 = vmul.f32 1.442695, %v966_v41  ;;  %2382 = vpow2.f32 %v1074_v13 }
 0x254   : > { %v2363_v48 = vpop.eup %2362  ;;  %2384 = vpow2.f32 %v1078_v52  ;;  %v1042_v52 = vmul.f32 1.442695, %v941_v63  ;;  %v967_v63 = vsub.f32 %v3092_v16, %v3161_v3  ;;  %v961_v16 = vsub.f32 %v3041_v10, %v3161_v3 }
 0x255   : > { %v1116_v50 = vadd.f32 %v3297_v58, %v1115_v17  ;;  %v1138_v11 = vadd.f32 %v3311_v53, %v1137_v6  ;;  %v3325_v28 = vpop.eup %2364  ;;  %v1038_v6 = vmul.f32 1.442695, %v939_v39  ;;  %2386 = vpow2.f32 %v1092_v45 }
 0x256   : > { %v3329_v55 = vpop.eup %2366  ;;  %2388 = vpow2.f32 %v1034_v9  ;;  %v1196_v10 = vpack.c.bf16 %v3200_v8, %v3196_v0 }
 0x257   : > { %v1117_v19 = vadd.f32 %v3218_v61, %v1116_v50  ;;  %v1139_v21 = vadd.f32 %v3315_v42, %v1138_v11  ;;  %v3333_v35 = vpop.eup %2368  ;;  %v943_v61 = vsub.f32 %v2985_v25, %v3161_v3  ;;  %2390 = vpow2.f32 %v1038_v6 }
 0x258   : > { %v1201_v17 = vpack.c.bf16 %v3333_v35, %v3329_v55  ;;  %v2371_v13 = vpop.eup %2370  ;;  %v965_v11 = vsub.f32 %v3066_v60, %v3161_v3  ;;  %2392 = vpow2.f32 %v1042_v52  ;;  %v953_v60 = vsub.f32 %v3009_v37, %v3161_v3 }
 0x259   : > { %v1118_v46 = vadd.f32 %v3223_v54, %v1117_v19  ;;  %v1140_v23 = vadd.f32 %v3319_v1, %v1139_v21  ;;  %v945_v54 = vsub.f32 %v2989_v27, %v3161_v3  ;;  %v2373_v50 = vpop.eup %2372  ;;  %v947_v19 = vsub.f32 %v2993_v29, %v3161_v3 }
 0x25a   : > { %1298 = vmatprep.subr.bf16.mxu0 %v1201_v17  ;;  %2090 = vmatprep.subr.bf16.mxu1 %v1201_v17  ;;  %v2375_v45 = vpop.eup %2374  ;;  %v949_v27 = vsub.f32 %v2997_v31, %v3161_v3  ;;  %v1046_v26 = vmul.f32 1.442695, %v943_v61  ;;  %v1198_v29 = vpack.c.bf16 %v3209_v44, %v3205_v18  ;;  %v951_v61 = vsub.f32 %v3001_v33, %v3161_v3 }
 0x25b   : > { %v1119_v41 = vadd.f32 %v3229_v51, %v1118_v46  ;;  %v1141_v39 = vadd.f32 %v2371_v13, %v1140_v23  ;;  %v1199_v51 = vpack.c.bf16 %v3325_v28, %v2363_v48  ;;  %1299 = vmatpush1.bf16.msra.mxu0 %v1200_v2  ;;  %2106 = vmatpush1.bf16.msra.mxu1 %v1200_v2  ;;  %v1050_v46 = vmul.f32 1.442695, %v945_v54  ;;  %v3359_v21 = vpop.eup %2376 }
 0x25c   : > { %v1054_v6 = vmul.f32 1.442695, %v947_v19  ;;  %2394 = vpow2.f32 %v1046_v26  ;;  %v963_v33 = vsub.f32 %v3054_v24, %v3161_v3  ;;  %v1090_v37 = vmul.f32 1.442695, %v965_v11 }
 0x25d   : > { %v1120_v25 = vadd.f32 %v3236_v49, %v1119_v41  ;;  %v1142_v49 = vadd.f32 %v2373_v50, %v1141_v39  ;;  %1300 = vmatprep.subr.bf16.mxu0 %v1199_v51  ;;  %2091 = vmatprep.subr.bf16.mxu1 %v1199_v51  ;;  %v1094_v17 = vmul.f32 1.442695, %v967_v63  ;;  %2396 = vpow2.f32 %v1050_v46 }
 0x25e   : > { %v3367_v18 = vpop.eup %2378  ;;  %2398 = vpow2.f32 %v1054_v6  ;;  %v1062_v24 = vmul.f32 1.442695, %v951_v61  ;;  %v1066_v39 = vmul.f32 1.442695, %v953_v60  ;;  %v1189_v11 = vpack.c.bf16 %v3293_v36, %v3283_v15  ;;  %v3832_v61 = vld [vmem:[#allocation24_spill] sm:$0xff] }
 0x25f   : > { %v1121_v47 = vadd.f32 %v3242_v14, %v1120_v25  ;;  %v1143_v9 = vadd.f32 %v2375_v45, %v1142_v49  ;;  %v1197_v14 = vpack.c.bf16 %v2375_v45, %v2373_v50  ;;  %1301 = vmatpush1.bf16.msra.mxu0 %v1198_v29  ;;  %2107 = vmatpush1.bf16.msra.mxu1 %v1198_v29  ;;  %v3370_v23 = vpop.eup %2380 }
 0x260   : > { %v3376_v54 = vpop.eup %2382  ;;  %v955_v25 = vsub.f32 %v3017_v43, %v3161_v3  ;;  %v1086_v43 = vmul.f32 1.442695, %v963_v33  ;;  %v1194_v3 = vpack.c.bf16 %v3191_v40, %v3187_v34  ;;  %v1193_v45 = vpack.c.bf16 %v3315_v42, %v3311_v53 }
 0x261   : > { %v1122_v31 = vadd.f32 %v3249_v32, %v1121_v47  ;;  %v1058_v32 = vmul.f32 1.442695, %v949_v27  ;;  %v1144_v41 = vadd.f32 %v2363_v48, %v1143_v9  ;;  %1302 = vmatprep.subr.bf16.mxu0 %v1197_v14  ;;  %2092 = vmatprep.subr.bf16.mxu1 %v1197_v14  ;;  %v1195_v48 = vpack.c.bf16 %v2371_v13, %v3319_v1  ;;  %v3381_v50 = vpop.eup %2384 }
 0x262   : > { %v3389_v1 = vpack.c.bf16 %v3381_v50, %v3376_v54  ;;  %v1082_v13 = vmul.f32 1.442695, %v961_v16  ;;  %v1070_v27 = vmul.f32 1.442695, %v955_v25  ;;  %v1192_v40 = vpack.c.bf16 %v3180_v22, %v3173_v12 }
 0x263   : > { %v1123_v44 = vadd.f32 %v3359_v21, %v1122_v31  ;;  %v1145_v2 = vadd.f32 %v3325_v28, %v1144_v41  ;;  %1303 = vmatpush1.bf16.msra.mxu0 %v1196_v10  ;;  %2108 = vmatpush1.bf16.msra.mxu1 %v1196_v10  ;;  %2400 = vpow2.f32 %v1058_v32  ;;  %v3391_v28 = vpop.eup %2386  ;;  %v1191_v42 = vpack.c.bf16 %v3305_v30, %v3303_v56 }
 0x264   : > { %1304 = vmatprep.subr.bf16.mxu0 %v1195_v48  ;;  %2093 = vmatprep.subr.bf16.mxu1 %v1195_v48  ;;  %2402 = vpow2.f32 %v1090_v37  ;;  %v3401_v19 = vpop.eup %2388  ;;  %v1190_v12 = vpack.c.bf16 %v3166_v38, %v3157_v5  ;;  %v1188_v29 = vpack.c.bf16 %v3150_v59, %v3143_v57  ;;  %v1187_v5 = vpack.c.bf16 %v3274_v7, %v3271_v20 }
 0x265   : > { %v1124_v52 = vadd.f32 %v3367_v18, %v1123_v44  ;;  %v1146_v8 = vadd.f32 %v3329_v55, %v1145_v2  ;;  %2404 = vpow2.f32 %v1094_v17  ;;  %v3404_v34 = vpop.eup %2390  ;;  %v1186_v60 = vpack.c.bf16 %v3832_v61, %v3131_v4 }
 0x266   : > { %2406 = vpow2.f32 %v1062_v24  ;;  %v1216_v7 = vpack.c.bf16 %v3391_v28, %v3370_v23  ;;  %v1214_v4 = vpack.c.bf16 %v3367_v18, %v3359_v21  ;;  %v3834_v18 = vld [vmem:[#allocation28_spill] sm:$0xff]  ;;  %v1206_v25 = vpack.c.bf16 %v3297_v58, %v3287_v62  ;;  %v3838_v58 = vld [vmem:[#allocation30_spill] sm:$0xff]  ;;  %v3839_v62 = vld [vmem:[#allocation31_spill] sm:$0xff] }
 0x267   : > { %v1125_v0 = vadd.f32 %v3370_v23, %v1124_v52  ;;  %v1147_v55 = vadd.f32 %v3333_v35, %v1146_v8  ;;  %1305 = vmatpush1.bf16.msra.mxu0 %v1194_v3  ;;  %2109 = vmatpush1.bf16.msra.mxu1 %v1194_v3  ;;  %2408 = vpow2.f32 %v1066_v39  ;;  %v3411_v35 = vpop.eup %2392  ;;  %v3833_v52 = vld [vmem:[#allocation29_spill] sm:$0xff]  ;;  %v3836_v39 = vld [vmem:[#allocation32_spill] sm:$0xff] }
 0x268   : > { %1306 = vmatprep.subr.bf16.mxu0 %v1193_v45  ;;  %2094 = vmatprep.subr.bf16.mxu1 %v1193_v45  ;;  %2410 = vpow2.f32 %v1082_v13  ;;  %v2256_v13 = vld [vmem:[%s2846_s7] ss:$8 sps:$4 sm:$0xff]   ;;  %v2262_v3 = vld [vmem:[%s2846_s7 + $0x14] ss:$8 sps:$4 sm:$0xff]   ;;  %v2266_v45 = vld [vmem:[%s2846_s7 + $0x10] ss:$8 sps:$4 sm:$0xff]  }
 0x269   : > { %v3396_v51 = vadd.f32 %v3391_v28, %v1125_v0  ;;  %v1148_v47 = vadd.f32 %v3401_v19, %v1147_v55  ;;  %2412 = vpow2.f32 %v1086_v43  ;;  %v3414_v49 = vpop.eup %2394  ;;  %v3837_v0 = vld [vmem:[#allocation21_spill] sm:$0xff]  ;;  %v1202_v28 = vpack.c.bf16 %v3839_v62, %v3838_v58  ;;  %v2264_v55 = vld [vmem:[%s2846_s7 + $0x34] ss:$8 sps:$4 sm:$0xff]  }
 0x26a   : > { %2414 = vpow2.f32 %v1070_v27  ;;  %v2397_v56 = vpop.eup %2396  ;;  %v1205_v24 = vpack.c.bf16 %v3414_v49, %v3411_v35  ;;  %v1204_v8 = vpack.c.bf16 %v3837_v0, %v3836_v39  ;;  %v2259_v43 = vld [vmem:[%s2846_s7 + $0x20] ss:$8 sps:$4 sm:$0xff]   ;;  %v2268_v27 = vld [vmem:[%s2846_s7 + $0x44] ss:$8 sps:$4 sm:$0xff]   ;;  %v1491_v58 = vld [vmem:[%s3742_s5 + $0x70] sm:$0xff] }
 0x26b   : > { %v1149_v53 = vadd.f32 %v3404_v34, %v1148_v47  ;;  %1307 = vmatpush1.bf16.msra.mxu0 %v1192_v40  ;;  %2110 = vmatpush1.bf16.msra.mxu1 %v1192_v40  ;;  %v2399_v30 = vpop.eup %2398  ;;  %v2270_v47 = vld [vmem:[%s2846_s7 + $0x40] ss:$8 sps:$4 sm:$0xff]   ;;  %v2273_v40 = vld [vmem:[%s2846_s7 + $0x50] ss:$8 sps:$4 sm:$0xff]  }
 0x26c   : > { %1308 = vmatprep.subr.bf16.mxu0 %v1191_v42  ;;  %2095 = vmatprep.subr.bf16.mxu1 %v1191_v42  ;;  %v1207_v48 = vpack.c.bf16 %v2399_v30, %v2397_v56  ;;  %v2276_v42 = vld [vmem:[%s2846_s7 + $0x60] ss:$8 sps:$4 sm:$0xff]  }
 0x26d   : > { %v1150_v26 = vadd.f32 %v3411_v35, %v1149_v53  ;;  %v2274_v53 = vld [vmem:[%s2846_s7 + $0x64] ss:$8 sps:$4 sm:$0xff]   ;;  %v2277_v35 = vld [vmem:[%s2846_s7 + $0x74] ss:$8 sps:$4 sm:$0xff]  }
 0x26e   : > { %v1489_v39 = vld [vmem:[%s3742_s5 + $0x60] sm:$0xff] }
 0x26f   : > { %v1151_v22 = vadd.f32 %v3414_v49, %v1150_v26  ;;  %1309 = vmatpush1.bf16.msra.mxu0 %v1190_v12  ;;  %2111 = vmatpush1.bf16.msra.mxu1 %v1190_v12  ;;  %v2279_v26 = vld [vmem:[%s2846_s7 + $0x70] ss:$8 sps:$4 sm:$0xff]   ;;  %v3840_v49 = vmov 0   ;;  %v1127_v12 = vrot.slane %v3396_v51, 4 }
 0x270   : > { %1310 = vmatprep.subr.bf16.mxu0 %v1189_v11  ;;  %2096 = vmatprep.subr.bf16.mxu1 %v1189_v11  ;;  %v2401_v46 = vpop.eup %2400 }
 0x271   : > { %v1152_v63 = vadd.f32 %v2397_v56, %v1151_v22  ;;  %v2403_v31 = vpop.eup %2402  ;;  %v1128_v22 = vadd.f32 %v1127_v12, %v3396_v51 }
 0x272   : > { %v2405_v38 = vpop.eup %2404 }
 0x273   : > { %v1153_v9 = vadd.f32 %v2399_v30, %v1152_v63  ;;  %1311 = vmatpush1.bf16.msra.mxu0 %v1188_v29  ;;  %2112 = vmatpush1.bf16.msra.mxu1 %v1188_v29  ;;  %v2407_v15 = vpop.eup %2406  ;;  %v1217_v44 = vpack.c.bf16 %v2405_v38, %v2403_v31  ;;  %v1129_v11 = vrot.slane %v1128_v22, 2 }
 0x274   : > { %1312 = vmatprep.subr.bf16.mxu0 %v1187_v5  ;;  %2097 = vmatprep.subr.bf16.mxu1 %v1187_v5  ;;  %v2409_v14 = vpop.eup %2408  ;;  %v1209_v21 = vpack.c.bf16 %v2407_v15, %v2401_v46 }
 0x275   : > { %v1154_v36 = vadd.f32 %v2401_v46, %v1153_v9  ;;  %v2411_v16 = vpop.eup %2410  ;;  %v1130_v56 = vadd.f32 %v1129_v11, %v1128_v22 }
 0x276   : > { %v2413_v57 = vpop.eup %2412 }
 0x277   : > { %v1155_v6 = vadd.f32 %v2407_v15, %v1154_v36  ;;  %1313 = vmatpush1.bf16.msra.mxu0 %v1186_v60  ;;  %2113 = vmatpush1.bf16.msra.mxu1 %v1186_v60  ;;  %v2415_v20 = vpop.eup %2414  ;;  %v1215_v41 = vpack.c.bf16 %v2413_v57, %v2411_v16  ;;  %v1131_v30 = vrot.slane %v1130_v56, 1  ;;  %v1478_v60 = vld [vmem:[%s3742_s5 + $0x8] sm:$0xff] }
 0x278   : > { %1314 = vmatprep.subr.bf16.mxu0 %v1217_v44  ;;  %2098 = vmatprep.subr.bf16.mxu1 %v1217_v44  ;;  %v1211_v10 = vpack.c.bf16 %v2415_v20, %v2409_v14 }
 0x279   : > { %v1156_v59 = vadd.f32 %v2409_v14, %v1155_v6  ;;  %v1132_v63 = vadd.f32 %v1131_v30, %v1130_v56  ;;  %1500 = vperm.xlu1 %2207, %v1478_v60  }
 0x27b   : > { %v1157_v32 = vadd.f32 %v2415_v20, %v1156_v59  ;;  %1315 = vmatpush2.bf16.msra.mxu0 %v1216_v7  ;;  %2114 = vmatpush2.bf16.msra.mxu1 %v1216_v7  ;;  %2416 = vrcp.f32 %v1132_v63  ;;  %v1481_v59 = vld [vmem:[%s3742_s5 + $0x20] sm:$0xff] }
 0x27c   : > { %1316 = vmatprep.subr.bf16.mxu0 %v1215_v41  ;;  %2099 = vmatprep.subr.bf16.mxu1 %v1215_v41  ;;  %v1480_v41 = vld [vmem:[%s3742_s5 + $0x18] sm:$0xff] }
 0x27d   : > { %v1158_v33 = vadd.f32 %v3376_v54, %v1157_v32 }
 0x27f   : > { %v1159_v37 = vadd.f32 %v3381_v50, %v1158_v33  ;;  %1317 = vmatpush2.bf16.msra.mxu0 %v1214_v4  ;;  %2115 = vmatpush2.bf16.msra.mxu1 %v1214_v4  ;;  %v3835_v50 = vld [vmem:[#allocation27_spill] sm:$0xff] }
 0x280   : > { %1318 = vmatprep.subr.bf16.mxu0 %v3389_v1  ;;  %2100 = vmatprep.subr.bf16.mxu1 %v3389_v1  ;;  %v1203_v1 = vpack.c.bf16 %v3404_v34, %v3401_v19  ;;  %v2267_v19 = vld [vmem:[%s2846_s7 + $0x30] ss:$8 sps:$4 sm:$0xff]   ;;  %v2271_v34 = vld [vmem:[%s2846_s7 + $0x54] ss:$8 sps:$4 sm:$0xff]   ;;  %s2532_s7 = scalar_lea.vmem %s3687_s23, 4096 }
 0x281   : > { %v1160_v17 = vadd.f32 %v2411_v16, %v1159_v37  ;;  %v1477_v16 = vld [vmem:[%s3742_s5] sm:$0xff]  ;;  %v1483_v33 = vld [vmem:[%s3742_s5 + $0x30] sm:$0xff]  ;;  %p2533_p8 = scmp.ne.s32.totalorder %s3687_s23, %s2532_s7 }
 0x282   : > { %1495 = vperm.xlu0 %2206, %v1477_v16  }
 0x283   : > { %v1161_v23 = vadd.f32 %v2413_v57, %v1160_v17  ;;  %1319 = vmatpush2.bf16.msra.mxu0 %v3833_v52  ;;  %2116 = vmatpush2.bf16.msra.mxu1 %v3833_v52  ;;  %v1479_v57 = vld [vmem:[%s3742_s5 + $0x10] sm:$0xff]  ;;  %p2534_p0 = pnand %p2533_p8, %p2724_p9 }
 0x284   : > { %1320 = vmatprep.subr.bf16.mxu0 %v1211_v10  ;;  %2101 = vmatprep.subr.bf16.mxu1 %v1211_v10  ;;  %v1485_v10 = vld [vmem:[%s3742_s5 + $0x40] sm:$0xff] }
 0x285   : > { %v1162_v54 = vadd.f32 %v2403_v31, %v1161_v23  ;;  %1505 = vperm.xlu1 %2207, %v1479_v57   ;;  %v1482_v23 = vld [vmem:[%s3742_s5 + $0x28] sm:$0xff]  ;;  %p2535_p3 = pneg %p2534_p0 }
 0x286   : > { %1515 = vperm.xlu0 %2206, %v1481_v59  }
 0x287   : > { %v3437_v2 = vadd.f32 %v2405_v38, %v1162_v54  ;;  %1321 = vmatpush2.bf16.msra.mxu0 %v3834_v18  ;;  %2117 = vmatpush2.bf16.msra.mxu1 %v3834_v18  ;;  %v1487_v18 = vld [vmem:[%s3742_s5 + $0x50] sm:$0xff] }
 0x288   : > { %1322 = vmatprep.subr.bf16.mxu0 %v1209_v21  ;;  %2102 = vmatprep.subr.bf16.mxu1 %v1209_v21  ;;  %v3470_v46 = vpop.eup %2416  ;;  %v1484_v21 = vld [vmem:[%s3742_s5 + $0x38] sm:$0xff] }
 0x289   : > { %v1164_v14 = vrot.slane %v3437_v2, 4  ;;  %1510 = vperm.xlu1 %2207, %v1480_v41  }
 0x28a   : > { %1525 = vperm.xlu0 %2206, %v1483_v33  }
 0x28b   : > { %1323 = vmatpush2.bf16.msra.mxu0 %v3835_v50  ;;  %2118 = vmatpush2.bf16.msra.mxu1 %v3835_v50  ;;  %v1165_v44 = vadd.f32 %v1164_v14, %v3437_v2 }
 0x28c   : > { %1324 = vmatprep.subr.bf16.mxu0 %v1207_v48  ;;  %2103 = vmatprep.subr.bf16.mxu1 %v1207_v48 }
 0x28d   : > { %v1166_v32 = vrot.slane %v1165_v44, 2  ;;  %1520 = vperm.xlu1 %2207, %v1482_v23  }
 0x28e   : > { %1535 = vperm.xlu0 %2206, %v1485_v10  }
 0x28f   : > { %1325 = vmatpush2.bf16.msra.mxu0 %v1206_v25  ;;  %2119 = vmatpush2.bf16.msra.mxu1 %v1206_v25  ;;  %v1167_v17 = vadd.f32 %v1166_v32, %v1165_v44 }
 0x290   : > { %1326 = vmatprep.subr.bf16.mxu0 %v1205_v24  ;;  %2104 = vmatprep.subr.bf16.mxu1 %v1205_v24  ;;  %v1486_v24 = vld [vmem:[%s3742_s5 + $0x48] sm:$0xff] }
 0x291   : > { %v1168_v2 = vrot.slane %v1167_v17, 1  ;;  %1530 = vperm.xlu1 %2207, %v1484_v21  }
 0x292   : > { %1545 = vperm.xlu0 %2206, %v1487_v18  }
 0x293   : > { %1327 = vmatpush2.bf16.msra.mxu0 %v1204_v8  ;;  %2120 = vmatpush2.bf16.msra.mxu1 %v1204_v8  ;;  %v1169_v25 = vadd.f32 %v1168_v2, %v1167_v17 }
 0x294   : > { %1328 = vmatprep.subr.bf16.mxu0 %v1203_v1  ;;  %2105 = vmatprep.subr.bf16.mxu1 %v1203_v1  ;;  %v1488_v1 = vld [vmem:[%s3742_s5 + $0x58] sm:$0xff] }
 0x295   : > { %1540 = vperm.xlu1 %2207, %v1486_v24   ;;  %2418 = vrcp.f32 %v1169_v25 }
 0x296   : > { %1555 = vperm.xlu0 %2206, %v1489_v39  }
 0x297   : > { %1329 = vmatpush2.bf16.msra.mxu0 %v1202_v28  ;;  %2121 = vmatpush2.bf16.msra.mxu1 %v1202_v28 }
 0x299   : > { %1550 = vperm.xlu1 %2207, %v1488_v1  }
 0x29a   : > { %1331 = vmatmul.mubr.bf16.vlgmr.msra.gmra.mxu0 %v2256_v13  ;;  %1351 = vmatmul.mubr.bf16.vlgmr.msra.gmra.mxu1 %v2259_v43  ;;  %v1490_v43 = vld [vmem:[%s3742_s5 + $0x68] sm:$0xff] }
 0x29b   : > { %1340 = vmatprep.mubr.bf16.mxu0 %v2262_v3  ;;  %1360 = vmatprep.mubr.bf16.mxu1 %v2264_v55 }
 0x29c   : > { %1565 = vperm.xlu0 %2206, %v1491_v58  }
 0x29d   : > { %1560 = vperm.xlu1 %2207, %v1490_v43  }
 0x2a2   : > { %1341 = vmatmul.mubr.bf16.gmra.mxu0 %v2266_v45  ;;  %1361 = vmatmul.mubr.bf16.gmra.mxu1 %v2267_v19  ;;  %v1492_v19 = vld [vmem:[%s3742_s5 + $0x78] sm:$0xff] }
 0x2a3   : > { %1370 = vmatprep.mubr.bf16.mxu1 %v2268_v27  ;;  %1570 = vperm.xlu1 %2207, %v1492_v19   ;;  %v2287_v19 = vld [vmem:[%s3741_s4 + $0x38] sm:$0xff]  }
 0x2aa   : > { %1371 = vmatmul.mubr.bf16.gmra.mxu1 %v2270_v47 }
 0x2ab   : > { %1380 = vmatprep.mubr.bf16.mxu1 %v2271_v34 }
 0x2b2   : > { %1381 = vmatmul.mubr.bf16.gmra.mxu1 %v2273_v40  ;;  %v2419_v40 = vpop.eup %2418 }
 0x2b3   : > { %1390 = vmatprep.mubr.bf16.mxu1 %v2274_v53 }
 0x2ba   : > { %1391 = vmatmul.mubr.bf16.gmra.mxu1 %v2276_v42 }
 0x2bb   : > { %1400 = vmatprep.mubr.bf16.mxu1 %v2277_v35 }
 0x2c2   : > { %1401 = vmatmul.mubr.bf16.gmra.mxu1 %v2279_v26 }
 0x2c3   : > { %1653 = vmatprep.mubr.bf16.mxu1 %v3840_v49 }
 0x35a   : > { %v1352_v29 = vpop.f32.mrf.mxu1  ;;  %v3542_v28 = vpop.f32.mrf.mxu0 }
 0x35b   : > { %v3473_v31 = vmul.f32 %v3470_v46, %v1352_v29  ;;  %v1413_v43 = vmul.f32 %v3470_v46, %v3542_v28  ;;  %v2285_v28 = vld [vmem:[%s3741_s4 + $0x28] sm:$0xff]  }
 0x35c   : > { %v3475_v9 = vpop.f32.mrf.mxu1  ;;  %v3547_v55 = vpop.f32.mrf.mxu0 }
 0x35d   : > { %v1422_v39 = vmul.f32 %v2419_v40, %v3475_v9 }
 0x35e   : > { %v1356_v5 = vpop.f32.mrf.mxu1  ;;  %v3552_v47 = vpop.f32.mrf.mxu0 }
 0x35f   : > { %v3478_v38 = vmul.f32 %v3470_v46, %v1356_v5  ;;  %v1415_v9 = vmul.f32 %v3470_v46, %v3552_v47 }
 0x360   : > { %v3480_v15 = vpop.f32.mrf.mxu1  ;;  %v1338_v22 = vpop.f32.mrf.mxu0 }
 0x361   : > { %v1465_v51 = vpack.c.bf16 %v3478_v38, %v3473_v31  ;;  %v1424_v25 = vmul.f32 %v2419_v40, %v3480_v15  ;;  %v1416_v1 = vmul.f32 %v2419_v40, %v1338_v22  ;;  %v2281_v31 = vld [vmem:[%s3741_s4 + $0x8] sm:$0xff]   ;;  %v2283_v38 = vld [vmem:[%s3741_s4 + $0x18] sm:$0xff]  }
 0x362   : > { %v3484_v36 = vpop.f32.mrf.mxu1  ;;  %v1342_v60 = vpop.f32.mrf.mxu0 }
 0x363   : > { %v1417_v15 = vmul.f32 %v3470_v46, %v1342_v60 }
 0x364   : > { %v3487_v61 = vpop.f32.mrf.mxu1  ;;  %v1344_v33 = vpop.f32.mrf.mxu0 }
 0x366   : > { %v3495_v6 = vpop.f32.mrf.mxu1 }
 0x368   : > { %v3504_v20 = vpop.f32.mrf.mxu1 }
 0x369   : > { %v1428_v21 = vmul.f32 %v2419_v40, %v3504_v20 }
 0x36a   : > { %v3506_v7 = vpop.f32.mrf.mxu1 }
 0x36c   : > { %v3514_v4 = vpop.f32.mrf.mxu1 }
 0x36d   : > { %v1430_v23 = vmul.f32 %v2419_v40, %v3514_v4 }
 0x36e   : > { %v3516_v37 = vpop.f32.mrf.mxu1 }
 0x36f   : > { %v1431_v10 = vmul.f32 %v3470_v46, %v3516_v37  ;;  %v1425_v37 = vmul.f32 %v3470_v46, %v3484_v36  ;;  %v1414_v36 = vmul.f32 %v2419_v40, %v3547_v55  ;;  %v2286_v55 = vld [vmem:[%s3741_s4 + $0x30] sm:$0xff]  }
 0x370   : > { %v1378_v52 = vpop.f32.mrf.mxu1 }
 0x371   : > { %v1432_v32 = vmul.f32 %v2419_v40, %v1378_v52  ;;  %v1426_v52 = vmul.f32 %v2419_v40, %v3487_v61  ;;  %v1418_v61 = vmul.f32 %v2419_v40, %v1344_v33 }
 0x372   : > { %v1382_v54 = vpop.f32.mrf.mxu1 }
 0x373   : > { %v1433_v17 = vmul.f32 %v3470_v46, %v1382_v54  ;;  %v1470_v18 = vpack.c.bf16 %v1432_v32, %v1430_v23  ;;  %v1427_v54 = vmul.f32 %v3470_v46, %v3495_v6  ;;  %v1468_v24 = vpack.c.bf16 %v1428_v21, %v1426_v52  ;;  %v1739_v32 = vld [vmem:[%s2851_s12 + $0x28] sm:$0xff]  ;;  %v1740_v23 = vld [vmem:[%s2851_s12 + $0x30] sm:$0xff] }
 0x374   : > { %v1384_v48 = vpop.f32.mrf.mxu1 }
 0x375   : > { %v1434_v44 = vmul.f32 %v2419_v40, %v1384_v48  ;;  %v1346_v48 = vpop.f32.mrf.mxu0 }
 0x376   : > { %v1386_v50 = vpop.f32.mrf.mxu1  ;;  %v1419_v6 = vmul.f32 %v3470_v46, %v1346_v48  ;;  %v1741_v48 = vld [vmem:[%s2851_s12 + $0x38] sm:$0xff] }
 0x377   : > { %v1435_v57 = vmul.f32 %v3470_v46, %v1386_v50  ;;  %v1429_v50 = vmul.f32 %v3470_v46, %v3506_v7  ;;  %v1348_v20 = vpop.f32.mrf.mxu0  ;;  %v1467_v7 = vpack.c.bf16 %v1427_v54, %v1425_v37 }
 0x378   : > { %v1388_v0 = vpop.f32.mrf.mxu1 }
 0x379   : > { %v1436_v5 = vmul.f32 %v2419_v40, %v1388_v0  ;;  %v1471_v2 = vpack.c.bf16 %v1435_v57, %v1433_v17  ;;  %v1469_v4 = vpack.c.bf16 %v1431_v10, %v1429_v50  ;;  %v1466_v0 = vpack.c.bf16 %v1424_v25, %v1422_v39  ;;  %v1742_v25 = vld [vmem:[%s2851_s12 + $0x40] sm:$0xff]  ;;  %v1743_v39 = vld [vmem:[%s2851_s12 + $0x48] sm:$0xff] }
 0x37a   : > { %v1392_v8 = vpop.f32.mrf.mxu1 }
 0x37b   : > { %v1437_v16 = vmul.f32 %v3470_v46, %v1392_v8  ;;  %v1472_v41 = vpack.c.bf16 %v1436_v5, %v1434_v44  ;;  %v1420_v8 = vmul.f32 %v2419_v40, %v1348_v20 }
 0x37c   : > { %v1394_v62 = vpop.f32.mrf.mxu1 }
 0x37d   : > { %v1438_v56 = vmul.f32 %v2419_v40, %v1394_v62  ;;  %v1464_v58 = vpack.c.bf16 %v1420_v8, %v1418_v61  ;;  %v1463_v62 = vpack.c.bf16 %v1419_v6, %v1417_v15  ;;  %v1744_v61 = vld [vmem:[%s2851_s12 + $0x50] sm:$0xff] }
 0x37e   : > { %v1396_v13 = vpop.f32.mrf.mxu1 }
 0x37f   : > { %v1439_v63 = vmul.f32 %v3470_v46, %v1396_v13  ;;  %v1462_v13 = vpack.c.bf16 %v1416_v1, %v1414_v36  ;;  %v1745_v36 = vld [vmem:[%s2851_s12 + $0x58] sm:$0xff] }
 0x380   : > { %v1398_v3 = vpop.f32.mrf.mxu1 }
 0x381   : > { %v1440_v35 = vmul.f32 %v2419_v40, %v1398_v3  ;;  %v1473_v59 = vpack.c.bf16 %v1439_v63, %v1437_v16  ;;  %v1461_v3 = vpack.c.bf16 %v1415_v9, %v1413_v43  ;;  %v1737_v63 = vld [vmem:[%s2851_s12 + $0x18] sm:$0xff]  ;;  %v1738_v16 = vld [vmem:[%s2851_s12 + $0x20] sm:$0xff] }
 0x382   : > { %v1402_v45 = vpop.f32.mrf.mxu1  ;;  %v1746_v43 = vld [vmem:[%s2851_s12 + $0x60] sm:$0xff] }
 0x383   : > { %v1441_v11 = vmul.f32 %v3470_v46, %v1402_v45  ;;  %v1474_v14 = vpack.c.bf16 %v1440_v35, %v1438_v56  ;;  %v2280_v45 = vld [vmem:[%s3741_s4] sm:$0xff]   ;;  %v1735_v35 = vld [vmem:[%s2851_s12 + $0x8] sm:$0xff] }
 0x384   : > { %v1404_v27 = vpop.f32.mrf.mxu1 }
 0x385   : > { %v1442_v26 = vmul.f32 %v2419_v40, %v1404_v27  ;;  %v1496_v27 = vpop.permute.xlu0 %1495 }
 0x386   : > { %v1406_v34 = vpop.f32.mrf.mxu1 }
 0x387   : > { %v1443_v53 = vmul.f32 %v3470_v46, %v1406_v34  ;;  %v2282_v46 = vld [vmem:[%s3741_s4 + $0x10] sm:$0xff]   ;;  %v1501_v34 = vpop.permute.xlu1 %1500 }
 0x388   : > { %v1408_v42 = vpop.f32.mrf.mxu1 }
 0x389   : > { %v1444_v12 = vmul.f32 %v2419_v40, %v1408_v42  ;;  %v1475_v29 = vpack.c.bf16 %v1443_v53, %v1441_v11  ;;  %v1734_v40 = vld [vmem:[%s2851_s12] sm:$0xff]  ;;  %v1736_v11 = vld [vmem:[%s2851_s12 + $0x10] sm:$0xff]  ;;  %v1516_v50 = vpop.permute.xlu0 %1515 }
 0x38b   : > { %v1476_v30 = vpack.c.bf16 %v1444_v12, %v1442_v26 }
 0x38d   : > { %1621 = vmatprep.subr.bf16.mxu1 %v1476_v30 }
 0x38e   : > { %1622 = vmatpush1.bf16.msra.mxu1 %v1475_v29  ;;  %v1506_v29 = vpop.permute.xlu1 %1505 }
 0x38f   : > { %1623 = vmatprep.subr.bf16.mxu1 %v1474_v14 }
 0x392   : > { %1624 = vmatpush1.bf16.msra.mxu1 %v1473_v59  ;;  %v1511_v10 = vpop.permute.xlu1 %1510 }
 0x393   : > { %1625 = vmatprep.subr.bf16.mxu1 %v1472_v41 }
 0x396   : > { %1626 = vmatpush1.bf16.msra.mxu1 %v1471_v2  ;;  %v1521_v6 = vpop.permute.xlu1 %1520 }
 0x397   : > { %1627 = vmatprep.subr.bf16.mxu1 %v1470_v18 }
 0x39a   : > { %1628 = vmatpush1.bf16.msra.mxu1 %v1469_v4 }
 0x39b   : > { %1629 = vmatprep.subr.bf16.mxu1 %v1468_v24 }
 0x39e   : > { %1630 = vmatpush1.bf16.msra.mxu1 %v1467_v7 }
 0x39f   : > { %1631 = vmatprep.subr.bf16.mxu1 %v1466_v0 }
 0x3a2   : > { %1632 = vmatpush1.bf16.msra.mxu1 %v1465_v51  ;;  %v2284_v51 = vld [vmem:[%s3741_s4 + $0x20] sm:$0xff]  }
 0x3a3   : > { %1633 = vmatprep.subr.bf16.mxu1 %v1464_v58 }
 0x3a6   : > { %1634 = vmatpush1.bf16.msra.mxu1 %v1463_v62 }
 0x3a7   : > { %1635 = vmatprep.subr.bf16.mxu1 %v1462_v13 }
 0x3aa   : > { %1636 = vmatpush1.bf16.msra.mxu1 %v1461_v3  ;;  %v1526_v3 = vpop.permute.xlu0 %1525 }
 0x3ad   : > { %1654 = vmatmul.mubr.bf16.vlgmr.msra.gmra.mxu1 %v2280_v45 }
 0x3ae   : > { %1663 = vmatprep.mubr.bf16.mxu1 %v3840_v49 }
 0x3b5   : > { %1664 = vmatmul.mubr.bf16.gmra.mxu1 %v2281_v31 }
 0x3b6   : > { %1673 = vmatprep.mubr.bf16.mxu1 %v3840_v49 }
 0x3bd   : > { %1674 = vmatmul.mubr.bf16.gmra.mxu1 %v2282_v46 }
 0x3be   : > { %1683 = vmatprep.mubr.bf16.mxu1 %v3840_v49 }
 0x3c5   : > { %1684 = vmatmul.mubr.bf16.gmra.mxu1 %v2283_v38  ;;  %v1747_v38 = vld [vmem:[%s2851_s12 + $0x68] sm:$0xff] }
 0x3c6   : > { %1693 = vmatprep.mubr.bf16.mxu1 %v3840_v49 }
 0x3cd   : > { %1694 = vmatmul.mubr.bf16.gmra.mxu1 %v2284_v51 }
 0x3ce   : > { %1703 = vmatprep.mubr.bf16.mxu1 %v3840_v49 }
 0x3d5   : > { %1704 = vmatmul.mubr.bf16.gmra.mxu1 %v2285_v28 }
 0x3d6   : > { %1713 = vmatprep.mubr.bf16.mxu1 %v3840_v49 }
 0x3dd   : > { %1714 = vmatmul.mubr.bf16.gmra.mxu1 %v2286_v55 }
 0x3de   : > { %1723 = vmatprep.mubr.bf16.mxu1 %v3840_v49 }
 0x3e5   : > { %1724 = vmatmul.mubr.bf16.gmra.mxu1 %v2287_v19  ;;  %v1748_v19 = vld [vmem:[%s2851_s12 + $0x70] sm:$0xff] }
 0x46d   : > { %v1655_v47 = vpop.f32.mrf.mxu1 }
 0x46e   : > { %v1656_v53 = vadd.f32 %v1655_v47, %v1496_v27 }
 0x46f   : > { %v1657_v42 = vpop.f32.mrf.mxu1 }
 0x470   : > { %v1658_v26 = vadd.f32 %v1657_v42, %v1496_v27  ;;  %v1766_v12 = vadd.f32 %v1734_v40, %v1656_v53  ;;  %v1531_v27 = vpop.permute.xlu1 %1530  ;;  %v1749_v53 = vld [vmem:[%s2851_s12 + $0x78] sm:$0xff] }
 0x471   : > { %v1659_v22 = vpop.f32.mrf.mxu1 }
 0x472   : > { %v1660_v49 = vadd.f32 %v1659_v22, %v1501_v34  ;;  %v1767_v56 = vadd.f32 %v1735_v35, %v1658_v26  ;;  %1798 = vst [vmem:[%s3619_s8] sm:$0xff] %v1766_v12  ;;  %v1750_v12 = vld [vmem:[%s2851_s12 + $0x80] sm:$0xff]  ;;  %v1536_v22 = vpop.permute.xlu0 %1535 }
 0x473   : > { %v1661_v30 = vpop.f32.mrf.mxu1 }
 0x474   : > { %v1662_v5 = vadd.f32 %v1661_v30, %v1501_v34  ;;  %v1768_v14 = vadd.f32 %v1736_v11, %v1660_v49  ;;  %1799 = vst [vmem:[%s3619_s8 + $0x8] sm:$0xff] %v1767_v56  ;;  %v1751_v30 = vld [vmem:[%s2851_s12 + $0x88] sm:$0xff] }
 0x475   : > { %v1665_v60 = vpop.f32.mrf.mxu1 }
 0x476   : > { %v1769_v44 = vadd.f32 %v1737_v63, %v1662_v5  ;;  %1800 = vst [vmem:[%s3619_s8 + $0x10] sm:$0xff] %v1768_v14  ;;  %v1666_v57 = vadd.f32 %v1665_v60, %v1506_v29  ;;  %v1541_v5 = vpop.permute.xlu1 %1540  ;;  %v1752_v60 = vld [vmem:[%s2851_s12 + $0x90] sm:$0xff] }
 0x477   : > { %v1667_v59 = vpop.f32.mrf.mxu1 }
 0x478   : > { %1801 = vst [vmem:[%s3619_s8 + $0x18] sm:$0xff] %v1769_v44  ;;  %v1668_v41 = vadd.f32 %v1667_v59, %v1506_v29  ;;  %v1770_v33 = vadd.f32 %v1738_v16, %v1666_v57  ;;  %v1753_v59 = vld [vmem:[%s2851_s12 + $0x98] sm:$0xff] }
 0x479   : > { %v1669_v17 = vpop.f32.mrf.mxu1 }
 0x47a   : > { %v1771_v2 = vadd.f32 %v1739_v32, %v1668_v41  ;;  %1802 = vst [vmem:[%s3619_s8 + $0x20] sm:$0xff] %v1770_v33  ;;  %v1670_v21 = vadd.f32 %v1669_v17, %v1511_v10  ;;  %v1754_v17 = vld [vmem:[%s2851_s12 + $0xa0] sm:$0xff] }
 0x47b   : > { %v1671_v18 = vpop.f32.mrf.mxu1 }
 0x47c   : > { %1803 = vst [vmem:[%s3619_s8 + $0x28] sm:$0xff] %v1771_v2  ;;  %v1672_v52 = vadd.f32 %v1671_v18, %v1511_v10  ;;  %v1772_v54 = vadd.f32 %v1740_v23, %v1670_v21  ;;  %v1546_v23 = vpop.permute.xlu0 %1545  ;;  %v1755_v18 = vld [vmem:[%s2851_s12 + $0xa8] sm:$0xff] }
 0x47d   : > { %v1675_v4 = vpop.f32.mrf.mxu1 }
 0x47e   : > { %v1773_v24 = vadd.f32 %v1741_v48, %v1672_v52  ;;  %1804 = vst [vmem:[%s3619_s8 + $0x30] sm:$0xff] %v1772_v54  ;;  %v1676_v37 = vadd.f32 %v1675_v4, %v1516_v50  ;;  %v1551_v52 = vpop.permute.xlu1 %1550  ;;  %v1756_v4 = vld [vmem:[%s2851_s12 + $0xb0] sm:$0xff] }
 0x47f   : > { %v1677_v20 = vpop.f32.mrf.mxu1 }
 0x480   : > { %1805 = vst [vmem:[%s3619_s8 + $0x38] sm:$0xff] %v1773_v24  ;;  %v1678_v7 = vadd.f32 %v1677_v20, %v1516_v50  ;;  %v1774_v0 = vadd.f32 %v1742_v25, %v1676_v37  ;;  %v1757_v20 = vld [vmem:[%s2851_s12 + $0xb8] sm:$0xff] }
 0x481   : > { %v1679_v8 = vpop.f32.mrf.mxu1 }
 0x482   : > { %v1680_v1 = vadd.f32 %v1679_v8, %v1521_v6  ;;  %v1775_v58 = vadd.f32 %v1743_v39, %v1678_v7  ;;  %1806 = vst [vmem:[%s3619_s8 + $0x40] sm:$0xff] %v1774_v0  ;;  %v1758_v8 = vld [vmem:[%s2851_s12 + $0xc0] sm:$0xff] }
 0x483   : > { %v1681_v15 = vpop.f32.mrf.mxu1 }
 0x484   : > { %v1682_v9 = vadd.f32 %v1681_v15, %v1521_v6  ;;  %v1776_v62 = vadd.f32 %v1744_v61, %v1680_v1  ;;  %1807 = vst [vmem:[%s3619_s8 + $0x48] sm:$0xff] %v1775_v58  ;;  %v1556_v61 = vpop.permute.xlu0 %1555  ;;  %v1759_v15 = vld [vmem:[%s2851_s12 + $0xc8] sm:$0xff] }
 0x485   : > { %v1685_v13 = vpop.f32.mrf.mxu1 }
 0x486   : > { %v1777_v45 = vadd.f32 %v1745_v36, %v1682_v9  ;;  %1808 = vst [vmem:[%s3619_s8 + $0x50] sm:$0xff] %v1776_v62  ;;  %v1686_v31 = vadd.f32 %v1685_v13, %v1526_v3  ;;  %v1561_v62 = vpop.permute.xlu1 %1560 }
 0x487   : > { %v1687_v46 = vpop.f32.mrf.mxu1 }
 0x488   : > { %1809 = vst [vmem:[%s3619_s8 + $0x58] sm:$0xff] %v1777_v45  ;;  %v1688_v51 = vadd.f32 %v1687_v46, %v1526_v3  ;;  %v1778_v28 = vadd.f32 %v1746_v43, %v1686_v31  ;;  %v1760_v43 = vld [vmem:[%s2851_s12 + $0xd0] sm:$0xff]  ;;  %v1761_v46 = vld [vmem:[%s2851_s12 + $0xd8] sm:$0xff] }
 0x489   : > { %v1689_v55 = vpop.f32.mrf.mxu1 }
 0x48a   : > { %v1690_v47 = vadd.f32 %v1689_v55, %v1531_v27  ;;  %v1779_v34 = vadd.f32 %v1747_v38, %v1688_v51  ;;  %1810 = vst [vmem:[%s3619_s8 + $0x60] sm:$0xff] %v1778_v28  ;;  %v1566_v28 = vpop.permute.xlu0 %1565 }
 0x48b   : > { %v1691_v40 = vpop.f32.mrf.mxu1 }
 0x48c   : > { %v1692_v42 = vadd.f32 %v1691_v40, %v1531_v27  ;;  %v1780_v35 = vadd.f32 %v1748_v19, %v1690_v47  ;;  %1811 = vst [vmem:[%s3619_s8 + $0x68] sm:$0xff] %v1779_v34  ;;  %v1762_v19 = vld [vmem:[%s2851_s12 + $0xe0] sm:$0xff]  ;;  %v1763_v40 = vld [vmem:[%s2851_s12 + $0xe8] sm:$0xff] }
 0x48d   : > { %v1695_v26 = vpop.f32.mrf.mxu1 }
 0x48e   : > { %v1781_v11 = vadd.f32 %v1749_v53, %v1692_v42  ;;  %1812 = vst [vmem:[%s3619_s8 + $0x70] sm:$0xff] %v1780_v35  ;;  %v1696_v49 = vadd.f32 %v1695_v26, %v1536_v22  ;;  %v1571_v35 = vpop.permute.xlu1 %1570 }
 0x48f   : > { %v1697_v56 = vpop.f32.mrf.mxu1 }
 0x490   : > { %1813 = vst [vmem:[%s3619_s8 + $0x78] sm:$0xff] %v1781_v11  ;;  %v1698_v63 = vadd.f32 %v1697_v56, %v1536_v22  ;;  %v1782_v29 = vadd.f32 %v1750_v12, %v1696_v49  ;;  %v1764_v12 = vld [vmem:[%s2851_s12 + $0xf0] sm:$0xff]  ;;  %v1765_v56 = vld [vmem:[%s2851_s12 + $0xf8] sm:$0xff]  ;;  %s2631_s12 = smov [#allocation10]  }
 0x491   : > { %v1699_v14 = vpop.f32.mrf.mxu1  ;;  %s2536_s30 = sshll.u32 %s2631_s12, 4  ;;  %s2537_s30 = int_to_ptr.vmem [resolvable:$false] %s2536_s30 }
 0x492   : > { %v1700_v16 = vadd.f32 %v1699_v14, %v1541_v5  ;;  %v1783_v44 = vadd.f32 %v1751_v30, %v1698_v63  ;;  %1814 = vst [vmem:[%s3619_s8 + $0x80] sm:$0xff] %v1782_v29  ;;  %s2538_s27 = scalar_lea.vmem %s2537_s30, 8192  ;;  %p2539_p4 = scmp.lt.s32.totalorder %s3687_s23, %s2537_s30 }
 0x493   : > { %v1701_v57 = vpop.f32.mrf.mxu1  ;;  %p2540_p7 = scmp.lt.s32.totalorder %s2538_s27, %s2532_s7 }
 0x494   : > { %v1784_v32 = vadd.f32 %v1752_v60, %v1700_v16  ;;  %v1702_v41 = vadd.f32 %v1701_v57, %v1541_v5  ;;  %1815 = vst [vmem:[%s3619_s8 + $0x88] sm:$0xff] %v1783_v44 }
 0x495   : > { %v1705_v33 = vpop.f32.mrf.mxu1  ;;  %p2541_p10 = por %p2540_p7, %p2539_p4 }
 0x496   : > { %1816 = vst [vmem:[%s3619_s8 + $0x90] sm:$0xff] %v1784_v32  ;;  %v1785_v10 = vadd.f32 %v1753_v59, %v1702_v41  ;;  %v1706_v2 = vadd.f32 %v1705_v33, %v1546_v23 }
 0x497   : > { %v1707_v21 = vpop.f32.mrf.mxu1  ;;  %p2542_p13 = pnand %p2541_p10, %p2535_p3 }
 0x498   : > { %1817 = vst [vmem:[%s3619_s8 + $0x98] sm:$0xff] %v1785_v10  ;;  %v1708_v48 = vadd.f32 %v1707_v21, %v1546_v23  ;;  %v1786_v50 = vadd.f32 %v1754_v17, %v1706_v2 }
 0x499   : > { %v1709_v54 = vpop.f32.mrf.mxu1 }
 0x49a   : > { %v1710_v25 = vadd.f32 %v1709_v54, %v1551_v52  ;;  %v1787_v24 = vadd.f32 %v1755_v18, %v1708_v48  ;;  %1818 = vst [vmem:[%s3619_s8 + $0xa0] sm:$0xff] %v1786_v50 }
 0x49b   : > { %v1711_v37 = vpop.f32.mrf.mxu1 }
 0x49c   : > { %v1788_v39 = vadd.f32 %v1756_v4, %v1710_v25  ;;  %v1712_v7 = vadd.f32 %v1711_v37, %v1551_v52  ;;  %1819 = vst [vmem:[%s3619_s8 + $0xa8] sm:$0xff] %v1787_v24 }
 0x49d   : > { %v1715_v0 = vpop.f32.mrf.mxu1 }
 0x49e   : > { %1820 = vst [vmem:[%s3619_s8 + $0xb0] sm:$0xff] %v1788_v39  ;;  %v1789_v6 = vadd.f32 %v1757_v20, %v1712_v7  ;;  %v1716_v1 = vadd.f32 %v1715_v0, %v1556_v61 }
 0x49f   : > { %v1717_v58 = vpop.f32.mrf.mxu1 }
 0x4a0   : > { %1821 = vst [vmem:[%s3619_s8 + $0xb8] sm:$0xff] %v1789_v6  ;;  %v1718_v36 = vadd.f32 %v1717_v58, %v1556_v61  ;;  %v1790_v9 = vadd.f32 %v1758_v8, %v1716_v1 }
 0x4a1   : > { %v1719_v13 = vpop.f32.mrf.mxu1 }
 0x4a2   : > { %v1791_v3 = vadd.f32 %v1759_v15, %v1718_v36  ;;  %1822 = vst [vmem:[%s3619_s8 + $0xc0] sm:$0xff] %v1790_v9  ;;  %v1720_v45 = vadd.f32 %v1719_v13, %v1561_v62 }
 0x4a3   : > { %v1721_v31 = vpop.f32.mrf.mxu1 }
 0x4a4   : > { %1823 = vst [vmem:[%s3619_s8 + $0xc8] sm:$0xff] %v1791_v3  ;;  %v1792_v38 = vadd.f32 %v1760_v43, %v1720_v45  ;;  %v1722_v51 = vadd.f32 %v1721_v31, %v1561_v62 }
 0x4a5   : > { %v1725_v55 = vpop.f32.mrf.mxu1 }
 0x4a6   : > { %1824 = vst [vmem:[%s3619_s8 + $0xd0] sm:$0xff] %v1792_v38  ;;  %v1793_v27 = vadd.f32 %v1761_v46, %v1722_v51  ;;  %v1726_v47 = vadd.f32 %v1725_v55, %v1566_v28 }
 0x4a7   : > { %v1727_v34 = vpop.f32.mrf.mxu1 }
 0x4a8   : > { %1825 = vst [vmem:[%s3619_s8 + $0xd8] sm:$0xff] %v1793_v27  ;;  %v1794_v53 = vadd.f32 %v1762_v19, %v1726_v47  ;;  %v1728_v42 = vadd.f32 %v1727_v34, %v1566_v28 }
 0x4a9   : > { %v1729_v26 = vpop.f32.mrf.mxu1 }
 0x4aa   : > { %1826 = vst [vmem:[%s3619_s8 + $0xe0] sm:$0xff] %v1794_v53  ;;  %v1795_v22 = vadd.f32 %v1763_v40, %v1728_v42  ;;  %v1730_v11 = vadd.f32 %v1729_v26, %v1571_v35 }
 0x4ab   : > { %v1731_v49 = vpop.f32.mrf.mxu1 }
 0x4ac   : > { %1827 = vst [vmem:[%s3619_s8 + $0xe8] sm:$0xff] %v1795_v22  ;;  %v1796_v30 = vadd.f32 %v1764_v12, %v1730_v11  ;;  %v1732_v63 = vadd.f32 %v1731_v49, %v1571_v35 }
 0x4ae   : > { %1828 = vst [vmem:[%s3619_s8 + $0xf0] sm:$0xff] %v1796_v30  ;;  %v1797_v29 = vadd.f32 %v1765_v56, %v1732_v63 }
 0x4b0   : > { %1829 = vst [vmem:[%s3619_s8 + $0xf8] sm:$0xff] %v1797_v29 }
 0x4b1   : > { %2545 = shalt.err (!%p2542_p13)
}
 0x4b2   : > { %s2546_s9 = scalar_lea.hbm %s3685_s28, 4096  ;;  %s2550_s19 = scalar_lea.hbm %s3842_s29, 8192 }
 0x4b3   : > { %p2547_p12 = scmp.ne.s32.totalorder %s3685_s28, %s2546_s9  ;;  %p2551_p5 = scmp.lt.s32.totalorder %s3685_s28, %s3842_s29 }
 0x4b4   : > { %p2552_p6 = scmp.lt.s32.totalorder %s2550_s19, %s2546_s9 }
 0x4b5   : > { %p2548_p1 = pnand %p2547_p12, %p2724_p9 }
 0x4b6   : > { %p2553_p8 = por %p2552_p6, %p2551_p5 }
 0x4b7   : > { %p2549_p2 = pneg %p2548_p1 }
 0x4b9   : > { %p2554_p0 = pnand %p2553_p8, %p2549_p2 }
 0x4bb   : > { %2557 = shalt.err (!%p2554_p0)
}
 0x4bc   : > { %s2632_s1 = smov 256   ;;  %s2633_s6 = smov 16  }
 0x4bd   : > { %2130 = dma.vmem_to_hbm [thread:$0]  (%p2724_p9), %s3687_s23, 4096, %s3685_s28, %s1831_s24, %s2632_s1, %s2632_s1, %s2633_s6  }
 0x4be PF: > { %s3843_s21 = sld [smem:[#allocation15_spill]]  ;;  %p3845_p3 = scmp.ge.s32.totalorder %s2620_s26, 2 }
 0x4c0   : > { %p2146_p4 = pnand %p3845_p3, %p2731_p11 }
 0x4c2   : > { %p2147_p7 = pneg %p2146_p4 }
 0x4c4   : > { %s1861_s17 = sand.u32 1, %s3843_s21  }
 0x4c5   : > { %s1862_s11 = scalar_lea.sflag [#allocation4], %s1861_s17 }
 0x4c6   : > { %2595 = dma.done.wait (%p2147_p7), %s1862_s11, 4096  }
 0x4c7   : > { %2597 = vsyncadd (%p2147_p7), %s1862_s11, 4294963200  ;;  %s28_s26 = sadd.s32 1, %s2620_s26   ;;  %s3846_s16 = sld [smem:[#allocation16_spill]] }
 0x4c8   : > { %p25_p10 = scmp.ge.s32.totalorder %s28_s26, 4   ;;  %s3847_s23 = sld [smem:[#allocation19_spill]] }
 0x4c9   : > { %s3848_s13 = sld [smem:[#allocation17_spill]]  ;;  %s3849_s21 = smov %s2604_s22 }
 0x4ca   : > { %s3851_s24 = smov %s2616_s25 }
 0x4cb   :  { %27 = sbr.rel (!%p25_p10) target bundleno = 13 (0xd), region = 126 }
 0x4cd   : > { %s3850_s22 = smov %s3846_s16 }
 0x4cf   : > { %s3852_s25 = smov %s3848_s13 }
 0x4d0   :  { %1867 = vsyncpa [#allocation3], 1 }
 0x4d1   :  { %1869 = vsyncpa [#allocation3 + $0x1], 1 }
 0x4d2   :  { %1870 = vsyncpa [#allocation6], 1 }
 0x4d3   :  { %1872 = vsyncpa [#allocation6 + $0x1], 1 }
 0x4d4   :  { %1873 = vsyncpa [#allocation9], 1 }
 0x4d5   :  { %1875 = vsyncpa [#allocation9 + $0x1], 1 }
 0x4d6   :  { %1876 = vsyncpa [#allocation4], 1 }
 0x4d7   :  { %1878 = vsyncpa [#allocation4 + $0x1], 1 }

</bundles_post_ra>
